<compile_context>
chip_gen: v6e
topology: v6e:2x2x1
jax: 0.10.0
libtpu: 0.0.40
codegen_flags: <defaults>
</compile_context>

<pallas_src>
import functools

import jax
import jax.numpy as jnp
from jax.experimental import pallas as pl
from jax.experimental.pallas import tpu as pltpu

NEG_SLOPE = 0.2  # dgl GATConv default leaky_relu negative slope


def _round_up(x, m):
    return (x + m - 1) // m * m


def _tpu_generation():
    try:
        kind = jax.devices()[0].device_kind.lower()
    except Exception:
        return "other"
    if "v7" in kind or "tpu7" in kind:
        return "v7x"
    if "v6" in kind or "trillium" in kind:
        return "v6e"
    if "v5" in kind:
        return "v5"
    return "other"


# Per-generation defaults.  v7x is VMEM-tight (64 MiB physical) -> smaller dst tiles, ~56 MiB
# scoped limit, single-buffered residents.  v6e/v5e have 128 MiB -> big dst tiles amortize the
# per-grid-step overhead and push the adj stream toward the HBM roofline.  bf16 softmax math
# only where the VPU/EUP support it (v6e/v7x); f32 elsewhere.
_GEN_DEFAULTS = {
    "v7x":   dict(tile_nw=128, vmem_limit_bytes=56 * 1024 * 1024,
                  sm_dtype=jnp.bfloat16, single_buffer_residents=True),
    "v6e":   dict(tile_nw=512, vmem_limit_bytes=100 * 1024 * 1024,
                  sm_dtype=jnp.bfloat16, single_buffer_residents=False),
    "v5":    dict(tile_nw=512, vmem_limit_bytes=100 * 1024 * 1024,
                  sm_dtype=jnp.float32, single_buffer_residents=False),
    "other": dict(tile_nw=256, vmem_limit_bytes=None,
                  sm_dtype=jnp.float32, single_buffer_residents=False),
}


def _resolve_tile_nw(tile_nw, num_words):
    # int8 adjacency tiles want the sublane axis to be a multiple of 32.
    tile_nw = _round_up(max(32, int(tile_nw)), 32)
    return min(tile_nw, _round_up(num_words, 32))


def prepare_adjacency(adj, *, tile_nw):
    """Pad + convert the {0,1} adjacency to int8 once per graph.

    Call this outside the hot path and cache the result: it avoids re-writing / re-reading a
    full adjacency-sized array in HBM on every forward call, and int8 halves the dominant HBM
    stream of the kernel vs bf16.
    """
    num_words, num_sents = adj.shape
    tile_nw = _resolve_tile_nw(tile_nw, num_words)
    nw_p = _round_up(num_words, tile_nw)
    ns_p = _round_up(num_sents, 128)
    return jnp.zeros((nw_p, ns_p), jnp.int8).at[:num_words, :num_sents].set(
        adj.astype(jnp.int8))


def word_gat_kernel(adj_ref, word_ref, fs_ref, elt_ref,
                    w_dst_ref, ar_ref, gat_b_ref,
                    w1_ref, b1_ref, w2_ref, b2_ref,
                    out_ref, rst_ref, *, num_heads, head_dim, sm_dtype):
    # Adjacency tile, int8 {0,1} -> softmax dtype (two-step via f32 keeps the convert simple;
    # the second cast is a no-op when sm_dtype == f32).
    adj_c = adj_ref[...].astype(jnp.float32).astype(sm_dtype)      # (T, Ns)
    word = word_ref[...]                                           # (T, Wp) f32, lane-dense

    # Dst-side projection + attention logits er (per-tile work; bf16 x bf16 -> f32 on MXU,
    # er via a block-diagonal projector instead of per-head VPU reductions / transposes).
    feat_dst = jnp.dot(word.astype(jnp.bfloat16), w_dst_ref[...],
                       preferred_element_type=jnp.float32)         # (T, Wp)
    er = jnp.dot(feat_dst, ar_ref[...], preferred_element_type=jnp.float32)  # (T, Hp)

    # Src-side features were hoisted to XLA; load the bf16 copy once and slice per head.
    fs = fs_ref[...]                                               # (Ns, H*D) bf16

    # Zero the scratch: the head loop only writes the first H*D columns; the lane-padding
    # columns feed the residual/FFN path and must be 0 (not stale VMEM).
    rst_ref[...] = jnp.zeros_like(rst_ref)

    # NOTE: heads could be batched into one lax.dot_general; per the review that is a
    # second-order fix (MXU is not the binding slot here), so the unrolled loop is kept.
    for h in range(num_heads):
        lo = h * head_dim
        e = er[:, h:h + 1].astype(sm_dtype) + elt_ref[h:h + 1, :]  # (T, Ns) broadcast add
        e = jnp.where(e > 0, e, NEG_SLOPE * e)                     # leaky_relu
        # Unmasked row max is a valid softmax shift (shift-invariance); non-edges and padded
        # columns are zeroed by `* adj_c` below, so no -1e30 mask select is needed.
        m = jnp.max(e, axis=-1, keepdims=True)
        p = jnp.exp(e - m) * adj_c                                 # (T, Ns), sm_dtype
        denom = jnp.sum(p.astype(jnp.float32), axis=-1, keepdims=True)   # f32 accumulate
        acc = jnp.dot(p.astype(jnp.bfloat16), fs[:, lo:lo + head_dim],
                      preferred_element_type=jnp.float32)          # (T, D)
        # Fold the denominator into the narrow per-head output instead of a (T, Ns) divide;
        # isolated dst nodes (denom == 0) yield zeros, matching dgl edge_softmax.
        inv = pl.reciprocal(jnp.where(denom > 0, denom, 1.0), approx=True)
        rst_ref[:, lo:lo + head_dim] = acc * inv

    rst = rst_ref[...] + gat_b_ref[...]                            # (T, Wp)
    # ELU (clamp the exp argument so the unused positive branch cannot overflow).
    update = jnp.where(rst > 0, rst, jnp.exp(jnp.minimum(rst, 0.0)) - 1.0)

    # Residual + FeedForwardNetwork, all lane-dense (Wp / Fp are multiples of 128).
    x = word + update
    h1 = jnp.dot(x.astype(jnp.bfloat16), w1_ref[...],
                 preferred_element_type=jnp.float32) + b1_ref[...]
    h1 = jnp.maximum(h1, 0.0)
    out_ref[...] = jnp.dot(h1.astype(jnp.bfloat16), w2_ref[...],
                           preferred_element_type=jnp.float32) + b2_ref[...]


def word_gat_forward(adj, word_repr, sent_repr, params, *, num_heads,
                     tile_nw=None, sm_dtype=None):
    """adj may be the raw (Nw, Ns) {0,1} matrix or a cached prepare_adjacency() result."""
    cfg = _GEN_DEFAULTS[_tpu_generation()]
    if tile_nw is None:
        tile_nw = cfg["tile_nw"]
    if sm_dtype is None:
        sm_dtype = cfg["sm_dtype"]
    vmem_limit_bytes = cfg["vmem_limit_bytes"]
    single_buffer_residents = cfg["single_buffer_residents"]

    Nw, word_dim = word_repr.shape
    Ns, sent_dim = sent_repr.shape
    assert word_dim % num_heads == 0
    head_dim = word_dim // num_heads
    hd = num_heads * head_dim                      # == word_dim
    ffn_dim = params["ffn_w1"].shape[1]

    tile_nw = _resolve_tile_nw(tile_nw, Nw)
    nw_p = _round_up(Nw, tile_nw)
    ns_p = _round_up(Ns, 128)
    wd_p = _round_up(word_dim, 128)                # lane-dense feature width
    ffn_p = _round_up(ffn_dim, 128)
    h_sub = _round_up(num_heads, 8)                # sublane-aligned head axis for el_t
    h_lane = _round_up(num_heads, 128)             # lane-aligned head axis for er

    # --- adjacency: prefer a cached prepare_adjacency() result (int8, padded) --------------
    if adj.dtype == jnp.int8 and adj.shape == (nw_p, ns_p):
        adj_p = adj
    else:
        adj_p = prepare_adjacency(adj, tile_nw=tile_nw)

    # --- hoisted sentence-side work (once per call in XLA, not once per grid step) ---------
    f32 = jnp.float32
    feat_src = sent_repr.astype(f32) @ params["w_src"].astype(f32)            # (Ns, H*D)
    al = params["attn_l"].reshape(num_heads, head_dim).astype(f32)
    el_t = jnp.einsum("uhd,hd->hu", feat_src.reshape(Ns, num_heads, head_dim), al)  # (H, Ns)
    fs_p = jnp.zeros((ns_p, hd), jnp.bfloat16).at[:Ns].set(feat_src.astype(jnp.bfloat16))
    elt_p = jnp.zeros((h_sub, ns_p), sm_dtype).at[:num_heads, :Ns].set(el_t.astype(sm_dtype))

    # --- streamed dst-side input, padded lane-dense (zeros propagate through the maths) ----
    word_p = jnp.zeros((nw_p, wd_p), f32).at[:Nw, :word_dim].set(word_repr.astype(f32))

    # --- weights, padded to lane-dense shapes (tiny; cache outside the hot path if desired) -
    w_dst_p = jnp.zeros((wd_p, wd_p), jnp.bfloat16).at[:word_dim, :hd].set(
        params["w_dst"].astype(jnp.bfloat16))
    ar_vec = params["attn_r"].reshape(num_heads, head_dim).astype(f32)        # (H, D)
    eye = jnp.eye(num_heads, dtype=f32)
    ar_bd = (ar_vec[:, :, None] * eye[:, None, :]).reshape(hd, num_heads)     # block-diag
    ar_p = jnp.zeros((wd_p, h_lane), f32).at[:hd, :num_heads].set(ar_bd)
    gat_b_p = jnp.zeros((1, wd_p), f32).at[:, :hd].set(
        params["gat_bias"].reshape(1, hd).astype(f32))
    w1_p = jnp.zeros((wd_p, ffn_p), jnp.bfloat16).at[:word_dim, :ffn_dim].set(
        params["ffn_w1"].astype(jnp.bfloat16))
    b1_p = jnp.zeros((1, ffn_p), f32).at[:, :ffn_dim].set(
        params["ffn_b1"].reshape(1, ffn_dim).astype(f32))
    w2_p = jnp.zeros((ffn_p, wd_p), jnp.bfloat16).at[:ffn_dim, :word_dim].set(
        params["ffn_w2"].astype(jnp.bfloat16))
    b2_p = jnp.zeros((1, wd_p), f32).at[:, :word_dim].set(
        params["ffn_b2"].reshape(1, word_dim).astype(f32))

    grid = (nw_p // tile_nw,)
    kernel = functools.partial(word_gat_kernel, num_heads=num_heads,
                               head_dim=head_dim, sm_dtype=sm_dtype)

    compiler_kwargs = dict(dimension_semantics=("parallel",))   # megacore split over dst tiles
    if vmem_limit_bytes is not None:
        compiler_kwargs["vmem_limit_bytes"] = vmem_limit_bytes

    def build(single_buffered):
        res_kwargs = {"pipeline_mode": pl.Buffered(1)} if single_buffered else {}

        def tiled(shape):
            return pl.BlockSpec(shape, lambda i: (i, 0))

        def resident(shape):
            return pl.BlockSpec(shape, lambda i: (0, 0), **res_kwargs)

        return pl.pallas_call(
            kernel,
            out_shape=jax.ShapeDtypeStruct((nw_p, wd_p), jnp.float32),
            grid_spec=pltpu.PrefetchScalarGridSpec(
                num_scalar_prefetch=0,
                grid=grid,
                in_specs=[
                    # adj is the dominant stream; on v5e, sweep pipeline_mode=pl.Buffered(3)
                    # here if a profile shows exposed DMA between grid steps.
                    tiled((tile_nw, ns_p)),       # adj (streamed, int8)
                    tiled((tile_nw, wd_p)),       # word (streamed, f32, lane-dense)
                    resident((ns_p, hd)),         # feat_src (hoisted, bf16)
                    resident((h_sub, ns_p)),      # el_t (hoisted, sm_dtype)
                    resident((wd_p, wd_p)),       # w_dst (bf16)
                    resident((wd_p, h_lane)),     # AR block-diag projector (f32)
                    resident((1, wd_p)),          # gat bias
                    resident((wd_p, ffn_p)),      # ffn w1 (bf16)
                    resident((1, ffn_p)),         # ffn b1
                    resident((ffn_p, wd_p)),      # ffn w2 (bf16)
                    resident((1, wd_p)),          # ffn b2
                ],
                out_specs=tiled((tile_nw, wd_p)),
                scratch_shapes=[pltpu.VMEM((tile_nw, wd_p), jnp.float32)],
            ),
            compiler_params=pltpu.CompilerParams(**compiler_kwargs),
        )

    args = (adj_p, word_p, fs_p, elt_p, w_dst_p, ar_p, gat_b_p, w1_p, b1_p, w2_p, b2_p)
    if single_buffer_residents:
        try:
            out = build(True)(*args)
        except Exception:
            # TODO(synk): pl.Buffered(1) on resident specs is a v7x VMEM saving; fall back to
            # default double-buffering if this JAX version rejects pipeline_mode here.
            out = build(False)(*args)
    else:
        out = build(False)(*args)
    return out[:Nw, :word_dim]


def word_gat_reference(adj, word, sent, params, *, num_heads):
    """Pure-JAX (f32) reference for correctness check."""
    Nw, word_dim = word.shape
    D = word_dim // num_heads
    fs = (sent @ params["w_src"]).reshape(-1, num_heads, D)     # (Ns, H, D)
    fd = (word @ params["w_dst"]).reshape(-1, num_heads, D)     # (Nw, H, D)
    al = params["attn_l"].reshape(num_heads, D)
    ar = params["attn_r"].reshape(num_heads, D)
    el = jnp.einsum("uhd,hd->uh", fs, al)                       # (Ns, H)
    er = jnp.einsum("vhd,hd->vh", fd, ar)                       # (Nw, H)
    e = er[:, None, :] + el[None, :, :]                         # (Nw, Ns, H)
    e = jnp.where(e > 0, e, NEG_SLOPE * e)
    mask = adj[:, :, None] > 0
    e = jnp.where(mask, e, -1e30)
    m = jnp.max(e, axis=1, keepdims=True)
    p = jnp.exp(e - m) * adj[:, :, None]
    denom = jnp.sum(p, axis=1, keepdims=True)
    alpha = p / jnp.where(denom > 0, denom, 1.0)
    rst = jnp.einsum("vuh,uhd->vhd", alpha, fs).reshape(Nw, word_dim) + params["gat_bias"]
    update = jnp.where(rst > 0, rst, jnp.exp(rst) - 1.0)
    x = word + update
    h1 = jnp.maximum(x @ params["ffn_w1"] + params["ffn_b1"], 0.0)
    return h1 @ params["ffn_w2"] + params["ffn_b2"]


if __name__ == "__main__":
    # Small shapes that deliberately exercise padding (Nw not a multiple of the tile, Ns not a
    # multiple of 128, word_dim/ffn_dim below 128) and a multi-step grid.
    Nw, Ns = 50, 20                # word (dst) nodes, sentence (src) nodes
    word_dim, sent_dim = 32, 48
    num_heads = 4
    head_dim = word_dim // num_heads
    ffn_inner_dim = 64

    key = jax.random.PRNGKey(0)
    keys = jax.random.split(key, 10)

    word_repr = jax.random.normal(keys[0], (Nw, word_dim), jnp.float32)
    sent_repr = jax.random.normal(keys[1], (Ns, sent_dim), jnp.float32)

    # Deterministic bipartite adjacency: each word node gets two incoming sent edges;
    # word node 7 is made isolated to exercise the denom==0 guard.
    w_idx = jnp.arange(Nw)[:, None]
    s_idx = jnp.arange(Ns)[None, :]
    adj = ((s_idx == (w_idx % Ns)) | (s_idx == ((w_idx + 3) % Ns))).astype(jnp.float32)
    adj = adj.at[7].set(0.0)

    scale = 0.1
    params = {
        # GATConv((sent_dim, word_dim), word_dim//H, H): fc_src/fc_dst (no bias), attn vecs, output bias.
        "w_src": scale * jax.random.normal(keys[2], (sent_dim, num_heads * head_dim), jnp.float32),
        "w_dst": scale * jax.random.normal(keys[3], (word_dim, num_heads * head_dim), jnp.float32),
        "attn_l": scale * jax.random.normal(keys[4], (1, num_heads * head_dim), jnp.float32),
        "attn_r": scale * jax.random.normal(keys[5], (1, num_heads * head_dim), jnp.float32),
        "gat_bias": scale * jax.random.normal(keys[6], (1, num_heads * head_dim), jnp.float32),
        # FeedForwardNetwork(word_dim, ffn_inner_dim)
        "ffn_w1": scale * jax.random.normal(keys[7], (word_dim, ffn_inner_dim), jnp.float32),
        "ffn_b1": scale * jax.random.normal(keys[8], (1, ffn_inner_dim), jnp.float32),
        "ffn_w2": scale * jax.random.normal(keys[9], (ffn_inner_dim, word_dim), jnp.float32),
        "ffn_b2": jnp.zeros((1, word_dim), jnp.float32),
    }

    # Pad/convert the adjacency ONCE per graph (would be cached across forward calls).
    tile_nw = 32
    adj_prepared = prepare_adjacency(adj, tile_nw=tile_nw)

    out = word_gat_forward(adj_prepared, word_repr, sent_repr, params,
                           num_heads=num_heads, tile_nw=tile_nw)
    out = jax.block_until_ready(out)

    ref = word_gat_reference(adj, word_repr, sent_repr, params, num_heads=num_heads)
    assert out.shape == (Nw, word_dim)
    assert bool(jnp.all(jnp.isfinite(out)))
    # bf16 MXU operands + (on v6e/v7x) bf16 softmax math vs an all-f32 reference.
    assert jnp.allclose(out, ref, rtol=3e-2, atol=3e-2), "mismatch vs reference"

    print("KERNEL_OK")
</pallas_src>

<mosaic_0001>
module attributes {stable_mosaic.version = 11 : i64} {
  func.func @word_gat_kernel(%arg0: i32, %arg1: memref<32x128xi8, #tpu.memory_space<vmem>>, %arg2: memref<32x128xf32, #tpu.memory_space<vmem>>, %arg3: memref<128x32xbf16, #tpu.memory_space<vmem>>, %arg4: memref<8x128xf32, #tpu.memory_space<vmem>>, %arg5: memref<128x128xbf16, #tpu.memory_space<vmem>>, %arg6: memref<128x128xf32, #tpu.memory_space<vmem>>, %arg7: memref<1x128xf32, #tpu.memory_space<vmem>>, %arg8: memref<128x128xbf16, #tpu.memory_space<vmem>>, %arg9: memref<1x128xf32, #tpu.memory_space<vmem>>, %arg10: memref<128x128xbf16, #tpu.memory_space<vmem>>, %arg11: memref<1x128xf32, #tpu.memory_space<vmem>>, %arg12: memref<32x128xf32, #tpu.memory_space<vmem>>, %arg13: memref<32x128xf32, #tpu.memory_space<vmem>>) attributes {dimension_semantics = [#tpu.dimension_semantics<parallel>], iteration_bounds = array<i64: 2>, scalar_prefetch = 0 : i64, scratch_operands = 1 : i64, tpu.core_type = #tpu.core_type<tc>, window_params = [{transform_indices = @transform_0, window_bounds = array<i64: 32, 128>}, {transform_indices = @transform_1, window_bounds = array<i64: 32, 128>}, {pipeline_mode = #tpu.pipeline_mode<synchronous>, transform_indices = @transform_2, window_bounds = array<i64: 128, 32>}, {pipeline_mode = #tpu.pipeline_mode<synchronous>, transform_indices = @transform_3, window_bounds = array<i64: 8, 128>}, {pipeline_mode = #tpu.pipeline_mode<synchronous>, transform_indices = @transform_4, window_bounds = array<i64: 128, 128>}, {pipeline_mode = #tpu.pipeline_mode<synchronous>, transform_indices = @transform_5, window_bounds = array<i64: 128, 128>}, {pipeline_mode = #tpu.pipeline_mode<synchronous>, transform_indices = @transform_6, window_bounds = array<i64: 1, 128>}, {pipeline_mode = #tpu.pipeline_mode<synchronous>, transform_indices = @transform_7, window_bounds = array<i64: 128, 128>}, {pipeline_mode = #tpu.pipeline_mode<synchronous>, transform_indices = @transform_8, window_bounds = array<i64: 1, 128>}, {pipeline_mode = #tpu.pipeline_mode<synchronous>, transform_indices = @transform_9, window_bounds = array<i64: 128, 128>}, {pipeline_mode = #tpu.pipeline_mode<synchronous>, transform_indices = @transform_10, window_bounds = array<i64: 1, 128>}, {transform_indices = @transform_11, window_bounds = array<i64: 32, 128>}]} {
    %c0 = arith.constant 0 : index
    %c0_0 = arith.constant 0 : index
    %0 = vector.load %arg1[%c0, %c0_0] : memref<32x128xi8, #tpu.memory_space<vmem>>, vector<32x128xi8>
    %1 = arith.sitofp %0 : vector<32x128xi8> to vector<32x128xf32>
    %c0_1 = arith.constant 0 : index
    %c0_2 = arith.constant 0 : index
    %2 = vector.load %arg2[%c0_1, %c0_2] : memref<32x128xf32, #tpu.memory_space<vmem>>, vector<32x128xf32>
    %3 = arith.truncf %2 : vector<32x128xf32> to vector<32x128xbf16>
    %c0_3 = arith.constant 0 : index
    %c0_4 = arith.constant 0 : index
    %4 = vector.load %arg5[%c0_3, %c0_4] : memref<128x128xbf16, #tpu.memory_space<vmem>>, vector<128x128xbf16>
    %cst = arith.constant dense<0.000000e+00> : vector<32x128xf32>
    %5 = tpu.matmul %3, %4, %cst {dimension_numbers = #tpu.dot_dimension_numbers<[1], [0], [0], [1], [0, 0, 1, 1], [], []>} : vector<32x128xbf16>, vector<128x128xbf16>, vector<32x128xf32> -> vector<32x128xf32>
    %c0_5 = arith.constant 0 : index
    %c0_6 = arith.constant 0 : index
    %6 = vector.load %arg6[%c0_5, %c0_6] : memref<128x128xf32, #tpu.memory_space<vmem>>, vector<128x128xf32>
    %cst_7 = arith.constant dense<0.000000e+00> : vector<32x128xf32>
    %7 = tpu.matmul %5, %6, %cst_7 {dimension_numbers = #tpu.dot_dimension_numbers<[1], [0], [0], [1], [0, 0, 1, 1], [], []>} : vector<32x128xf32>, vector<128x128xf32>, vector<32x128xf32> -> vector<32x128xf32>
    %c0_8 = arith.constant 0 : index
    %c0_9 = arith.constant 0 : index
    %8 = vector.load %arg3[%c0_8, %c0_9] : memref<128x32xbf16, #tpu.memory_space<vmem>>, vector<128x32xbf16>
    %cst_10 = arith.constant 0.000000e+00 : f32
    %9 = vector.broadcast %cst_10 : f32 to vector<32x128xf32>
    %c0_11 = arith.constant 0 : index
    %c0_12 = arith.constant 0 : index
    %10 = vector.load %arg13[%c0_11, %c0_12] : memref<32x128xf32, #tpu.memory_space<vmem>>, vector<32x128xf32>
    tpu.vector_store %arg13[%c0_11, %c0_12], %9 {strides = array<i32>} : memref<32x128xf32, #tpu.memory_space<vmem>>, vector<32x128xf32>,
    %11 = vector.extract_strided_slice %7 {offsets = [0, 0], sizes = [32, 1], strides = [1, 1]} : vector<32x128xf32> to vector<32x1xf32>
    %c0_13 = arith.constant 0 : index
    %c0_14 = arith.constant 0 : index
    %12 = vector.load %arg4[%c0_13, %c0_14] : memref<8x128xf32, #tpu.memory_space<vmem>>, vector<1x128xf32>
    %13 = vector.broadcast %11 : vector<32x1xf32> to vector<32x128xf32>
    %14 = vector.broadcast %12 : vector<1x128xf32> to vector<32x128xf32>
    %15 = arith.addf %13, %14 : vector<32x128xf32>
    %cst_15 = arith.constant 0.000000e+00 : f32
    %16 = vector.broadcast %cst_15 : f32 to vector<32x128xf32>
    %17 = arith.cmpf ogt, %15, %16 : vector<32x128xf32>
    %cst_16 = arith.constant 2.000000e-01 : f32
    %18 = vector.broadcast %cst_16 : f32 to vector<32x128xf32>
    %19 = arith.mulf %18, %15 : vector<32x128xf32>
    %20 = arith.select %17, %15, %19 : vector<32x128xi1>, vector<32x128xf32>
    %cst_17 = arith.constant dense<0xFF800000> : vector<32xf32>
    %21 = vector.multi_reduction <maximumf>, %20, %cst_17 [1] : vector<32x128xf32> to vector<32xf32>
    %22 = vector.shape_cast %21 : vector<32xf32> to vector<32x1xf32>
    %23 = vector.broadcast %22 : vector<32x1xf32> to vector<32x128xf32>
    %24 = arith.subf %20, %23 : vector<32x128xf32>
    %25 = math.exp %24 : vector<32x128xf32>
    %26 = arith.mulf %25, %1 : vector<32x128xf32>
    %cst_18 = arith.constant dense<0.000000e+00> : vector<32xf32>
    %27 = vector.multi_reduction <add>, %26, %cst_18 [1] : vector<32x128xf32> to vector<32xf32>
    %28 = vector.shape_cast %27 : vector<32xf32> to vector<32x1xf32>
    %29 = arith.truncf %26 : vector<32x128xf32> to vector<32x128xbf16>
    %30 = vector.extract_strided_slice %8 {offsets = [0, 0], sizes = [128, 8], strides = [1, 1]} : vector<128x32xbf16> to vector<128x8xbf16>
    %cst_19 = arith.constant dense<0.000000e+00> : vector<32x8xf32>
    %31 = tpu.matmul %29, %30, %cst_19 {dimension_numbers = #tpu.dot_dimension_numbers<[1], [0], [0], [1], [0, 0, 1, 1], [], []>} : vector<32x128xbf16>, vector<128x8xbf16>, vector<32x8xf32> -> vector<32x8xf32>
    %cst_20 = arith.constant 0.000000e+00 : f32
    %32 = vector.broadcast %cst_20 : f32 to vector<32x1xf32>
    %33 = arith.cmpf ogt, %28, %32 : vector<32x1xf32>
    %cst_21 = arith.constant 1.000000e+00 : f32
    %34 = vector.broadcast %cst_21 : f32 to vector<32x1xf32>
    %35 = arith.select %33, %28, %34 : vector<32x1xi1>, vector<32x1xf32>
    %36 = tpu.reciprocal %35 {approx = true} : vector<32x1xf32> -> vector<32x1xf32>
    %37 = vector.broadcast %36 : vector<32x1xf32> to vector<32x8xf32>
    %38 = arith.mulf %31, %37 : vector<32x8xf32>
    %c0_22 = arith.constant 0 : index
    %c0_23 = arith.constant 0 : index
    %39 = vector.load %arg13[%c0_22, %c0_23] : memref<32x128xf32, #tpu.memory_space<vmem>>, vector<32x8xf32>
    tpu.vector_store %arg13[%c0_22, %c0_23], %38 {strides = array<i32>} : memref<32x128xf32, #tpu.memory_space<vmem>>, vector<32x8xf32>,
    %40 = vector.extract_strided_slice %7 {offsets = [0, 1], sizes = [32, 1], strides = [1, 1]} : vector<32x128xf32> to vector<32x1xf32>
    %c1 = arith.constant 1 : index
    %c0_24 = arith.constant 0 : index
    %41 = vector.load %arg4[%c1, %c0_24] : memref<8x128xf32, #tpu.memory_space<vmem>>, vector<1x128xf32>
    %42 = vector.broadcast %40 : vector<32x1xf32> to vector<32x128xf32>
    %43 = vector.broadcast %41 : vector<1x128xf32> to vector<32x128xf32>
    %44 = arith.addf %42, %43 : vector<32x128xf32>
    %cst_25 = arith.constant 0.000000e+00 : f32
    %45 = vector.broadcast %cst_25 : f32 to vector<32x128xf32>
    %46 = arith.cmpf ogt, %44, %45 : vector<32x128xf32>
    %cst_26 = arith.constant 2.000000e-01 : f32
    %47 = vector.broadcast %cst_26 : f32 to vector<32x128xf32>
    %48 = arith.mulf %47, %44 : vector<32x128xf32>
    %49 = arith.select %46, %44, %48 : vector<32x128xi1>, vector<32x128xf32>
    %cst_27 = arith.constant dense<0xFF800000> : vector<32xf32>
    %50 = vector.multi_reduction <maximumf>, %49, %cst_27 [1] : vector<32x128xf32> to vector<32xf32>
    %51 = vector.shape_cast %50 : vector<32xf32> to vector<32x1xf32>
    %52 = vector.broadcast %51 : vector<32x1xf32> to vector<32x128xf32>
    %53 = arith.subf %49, %52 : vector<32x128xf32>
    %54 = math.exp %53 : vector<32x128xf32>
    %55 = arith.mulf %54, %1 : vector<32x128xf32>
    %cst_28 = arith.constant dense<0.000000e+00> : vector<32xf32>
    %56 = vector.multi_reduction <add>, %55, %cst_28 [1] : vector<32x128xf32> to vector<32xf32>
    %57 = vector.shape_cast %56 : vector<32xf32> to vector<32x1xf32>
    %58 = arith.truncf %55 : vector<32x128xf32> to vector<32x128xbf16>
    %59 = vector.extract_strided_slice %8 {offsets = [0, 8], sizes = [128, 8], strides = [1, 1]} : vector<128x32xbf16> to vector<128x8xbf16>
    %cst_29 = arith.constant dense<0.000000e+00> : vector<32x8xf32>
    %60 = tpu.matmul %58, %59, %cst_29 {dimension_numbers = #tpu.dot_dimension_numbers<[1], [0], [0], [1], [0, 0, 1, 1], [], []>} : vector<32x128xbf16>, vector<128x8xbf16>, vector<32x8xf32> -> vector<32x8xf32>
    %cst_30 = arith.constant 0.000000e+00 : f32
    %61 = vector.broadcast %cst_30 : f32 to vector<32x1xf32>
    %62 = arith.cmpf ogt, %57, %61 : vector<32x1xf32>
    %cst_31 = arith.constant 1.000000e+00 : f32
    %63 = vector.broadcast %cst_31 : f32 to vector<32x1xf32>
    %64 = arith.select %62, %57, %63 : vector<32x1xi1>, vector<32x1xf32>
    %65 = tpu.reciprocal %64 {approx = true} : vector<32x1xf32> -> vector<32x1xf32>
    %66 = vector.broadcast %65 : vector<32x1xf32> to vector<32x8xf32>
    %67 = arith.mulf %60, %66 : vector<32x8xf32>
    %c0_32 = arith.constant 0 : index
    %c8 = arith.constant 8 : index
    %68 = vector.load %arg13[%c0_32, %c8] : memref<32x128xf32, #tpu.memory_space<vmem>>, vector<32x8xf32>
    tpu.vector_store %arg13[%c0_32, %c8], %67 {strides = array<i32>} : memref<32x128xf32, #tpu.memory_space<vmem>>, vector<32x8xf32>,
    %69 = vector.extract_strided_slice %7 {offsets = [0, 2], sizes = [32, 1], strides = [1, 1]} : vector<32x128xf32> to vector<32x1xf32>
    %c2 = arith.constant 2 : index
    %c0_33 = arith.constant 0 : index
    %70 = vector.load %arg4[%c2, %c0_33] : memref<8x128xf32, #tpu.memory_space<vmem>>, vector<1x128xf32>
    %71 = vector.broadcast %69 : vector<32x1xf32> to vector<32x128xf32>
    %72 = vector.broadcast %70 : vector<1x128xf32> to vector<32x128xf32>
    %73 = arith.addf %71, %72 : vector<32x128xf32>
    %cst_34 = arith.constant 0.000000e+00 : f32
    %74 = vector.broadcast %cst_34 : f32 to vector<32x128xf32>
    %75 = arith.cmpf ogt, %73, %74 : vector<32x128xf32>
    %cst_35 = arith.constant 2.000000e-01 : f32
    %76 = vector.broadcast %cst_35 : f32 to vector<32x128xf32>
    %77 = arith.mulf %76, %73 : vector<32x128xf32>
    %78 = arith.select %75, %73, %77 : vector<32x128xi1>, vector<32x128xf32>
    %cst_36 = arith.constant dense<0xFF800000> : vector<32xf32>
    %79 = vector.multi_reduction <maximumf>, %78, %cst_36 [1] : vector<32x128xf32> to vector<32xf32>
    %80 = vector.shape_cast %79 : vector<32xf32> to vector<32x1xf32>
    %81 = vector.broadcast %80 : vector<32x1xf32> to vector<32x128xf32>
    %82 = arith.subf %78, %81 : vector<32x128xf32>
    %83 = math.exp %82 : vector<32x128xf32>
    %84 = arith.mulf %83, %1 : vector<32x128xf32>
    %cst_37 = arith.constant dense<0.000000e+00> : vector<32xf32>
    %85 = vector.multi_reduction <add>, %84, %cst_37 [1] : vector<32x128xf32> to vector<32xf32>
    %86 = vector.shape_cast %85 : vector<32xf32> to vector<32x1xf32>
    %87 = arith.truncf %84 : vector<32x128xf32> to vector<32x128xbf16>
    %88 = vector.extract_strided_slice %8 {offsets = [0, 16], sizes = [128, 8], strides = [1, 1]} : vector<128x32xbf16> to vector<128x8xbf16>
    %cst_38 = arith.constant dense<0.000000e+00> : vector<32x8xf32>
    %89 = tpu.matmul %87, %88, %cst_38 {dimension_numbers = #tpu.dot_dimension_numbers<[1], [0], [0], [1], [0, 0, 1, 1], [], []>} : vector<32x128xbf16>, vector<128x8xbf16>, vector<32x8xf32> -> vector<32x8xf32>
    %cst_39 = arith.constant 0.000000e+00 : f32
    %90 = vector.broadcast %cst_39 : f32 to vector<32x1xf32>
    %91 = arith.cmpf ogt, %86, %90 : vector<32x1xf32>
    %cst_40 = arith.constant 1.000000e+00 : f32
    %92 = vector.broadcast %cst_40 : f32 to vector<32x1xf32>
    %93 = arith.select %91, %86, %92 : vector<32x1xi1>, vector<32x1xf32>
    %94 = tpu.reciprocal %93 {approx = true} : vector<32x1xf32> -> vector<32x1xf32>
    %95 = vector.broadcast %94 : vector<32x1xf32> to vector<32x8xf32>
    %96 = arith.mulf %89, %95 : vector<32x8xf32>
    %c0_41 = arith.constant 0 : index
    %c16 = arith.constant 16 : index
    %97 = vector.load %arg13[%c0_41, %c16] : memref<32x128xf32, #tpu.memory_space<vmem>>, vector<32x8xf32>
    tpu.vector_store %arg13[%c0_41, %c16], %96 {strides = array<i32>} : memref<32x128xf32, #tpu.memory_space<vmem>>, vector<32x8xf32>,
    %98 = vector.extract_strided_slice %7 {offsets = [0, 3], sizes = [32, 1], strides = [1, 1]} : vector<32x128xf32> to vector<32x1xf32>
    %c3 = arith.constant 3 : index
    %c0_42 = arith.constant 0 : index
    %99 = vector.load %arg4[%c3, %c0_42] : memref<8x128xf32, #tpu.memory_space<vmem>>, vector<1x128xf32>
    %100 = vector.broadcast %98 : vector<32x1xf32> to vector<32x128xf32>
    %101 = vector.broadcast %99 : vector<1x128xf32> to vector<32x128xf32>
    %102 = arith.addf %100, %101 : vector<32x128xf32>
    %cst_43 = arith.constant 0.000000e+00 : f32
    %103 = vector.broadcast %cst_43 : f32 to vector<32x128xf32>
    %104 = arith.cmpf ogt, %102, %103 : vector<32x128xf32>
    %cst_44 = arith.constant 2.000000e-01 : f32
    %105 = vector.broadcast %cst_44 : f32 to vector<32x128xf32>
    %106 = arith.mulf %105, %102 : vector<32x128xf32>
    %107 = arith.select %104, %102, %106 : vector<32x128xi1>, vector<32x128xf32>
    %cst_45 = arith.constant dense<0xFF800000> : vector<32xf32>
    %108 = vector.multi_reduction <maximumf>, %107, %cst_45 [1] : vector<32x128xf32> to vector<32xf32>
    %109 = vector.shape_cast %108 : vector<32xf32> to vector<32x1xf32>
    %110 = vector.broadcast %109 : vector<32x1xf32> to vector<32x128xf32>
    %111 = arith.subf %107, %110 : vector<32x128xf32>
    %112 = math.exp %111 : vector<32x128xf32>
    %113 = arith.mulf %112, %1 : vector<32x128xf32>
    %cst_46 = arith.constant dense<0.000000e+00> : vector<32xf32>
    %114 = vector.multi_reduction <add>, %113, %cst_46 [1] : vector<32x128xf32> to vector<32xf32>
    %115 = vector.shape_cast %114 : vector<32xf32> to vector<32x1xf32>
    %116 = arith.truncf %113 : vector<32x128xf32> to vector<32x128xbf16>
    %117 = vector.extract_strided_slice %8 {offsets = [0, 24], sizes = [128, 8], strides = [1, 1]} : vector<128x32xbf16> to vector<128x8xbf16>
    %cst_47 = arith.constant dense<0.000000e+00> : vector<32x8xf32>
    %118 = tpu.matmul %116, %117, %cst_47 {dimension_numbers = #tpu.dot_dimension_numbers<[1], [0], [0], [1], [0, 0, 1, 1], [], []>} : vector<32x128xbf16>, vector<128x8xbf16>, vector<32x8xf32> -> vector<32x8xf32>
    %cst_48 = arith.constant 0.000000e+00 : f32
    %119 = vector.broadcast %cst_48 : f32 to vector<32x1xf32>
    %120 = arith.cmpf ogt, %115, %119 : vector<32x1xf32>
    %cst_49 = arith.constant 1.000000e+00 : f32
    %121 = vector.broadcast %cst_49 : f32 to vector<32x1xf32>
    %122 = arith.select %120, %115, %121 : vector<32x1xi1>, vector<32x1xf32>
    %123 = tpu.reciprocal %122 {approx = true} : vector<32x1xf32> -> vector<32x1xf32>
    %124 = vector.broadcast %123 : vector<32x1xf32> to vector<32x8xf32>
    %125 = arith.mulf %118, %124 : vector<32x8xf32>
    %c0_50 = arith.constant 0 : index
    %c24 = arith.constant 24 : index
    %126 = vector.load %arg13[%c0_50, %c24] : memref<32x128xf32, #tpu.memory_space<vmem>>, vector<32x8xf32>
    tpu.vector_store %arg13[%c0_50, %c24], %125 {strides = array<i32>} : memref<32x128xf32, #tpu.memory_space<vmem>>, vector<32x8xf32>,
    %c0_51 = arith.constant 0 : index
    %c0_52 = arith.constant 0 : index
    %127 = vector.load %arg13[%c0_51, %c0_52] : memref<32x128xf32, #tpu.memory_space<vmem>>, vector<32x128xf32>
    %c0_53 = arith.constant 0 : index
    %c0_54 = arith.constant 0 : index
    %128 = vector.load %arg7[%c0_53, %c0_54] : memref<1x128xf32, #tpu.memory_space<vmem>>, vector<1x128xf32>
    %129 = vector.broadcast %128 : vector<1x128xf32> to vector<32x128xf32>
    %130 = arith.addf %127, %129 : vector<32x128xf32>
    %cst_55 = arith.constant 0.000000e+00 : f32
    %131 = vector.broadcast %cst_55 : f32 to vector<32x128xf32>
    %132 = arith.cmpf ogt, %130, %131 : vector<32x128xf32>
    %cst_56 = arith.constant 0.000000e+00 : f32
    %133 = vector.broadcast %cst_56 : f32 to vector<32x128xf32>
    %134 = arith.minimumf %130, %133 : vector<32x128xf32>
    %135 = math.exp %134 : vector<32x128xf32>
    %cst_57 = arith.constant 1.000000e+00 : f32
    %136 = vector.broadcast %cst_57 : f32 to vector<32x128xf32>
    %137 = arith.subf %135, %136 : vector<32x128xf32>
    %138 = arith.select %132, %130, %137 : vector<32x128xi1>, vector<32x128xf32>
    %139 = arith.addf %2, %138 : vector<32x128xf32>
    %140 = arith.truncf %139 : vector<32x128xf32> to vector<32x128xbf16>
    %c0_58 = arith.constant 0 : index
    %c0_59 = arith.constant 0 : index
    %141 = vector.load %arg8[%c0_58, %c0_59] : memref<128x128xbf16, #tpu.memory_space<vmem>>, vector<128x128xbf16>
    %cst_60 = arith.constant dense<0.000000e+00> : vector<32x128xf32>
    %142 = tpu.matmul %140, %141, %cst_60 {dimension_numbers = #tpu.dot_dimension_numbers<[1], [0], [0], [1], [0, 0, 1, 1], [], []>} : vector<32x128xbf16>, vector<128x128xbf16>, vector<32x128xf32> -> vector<32x128xf32>
    %c0_61 = arith.constant 0 : index
    %c0_62 = arith.constant 0 : index
    %143 = vector.load %arg9[%c0_61, %c0_62] : memref<1x128xf32, #tpu.memory_space<vmem>>, vector<1x128xf32>
    %144 = vector.broadcast %143 : vector<1x128xf32> to vector<32x128xf32>
    %145 = arith.addf %142, %144 : vector<32x128xf32>
    %cst_63 = arith.constant 0.000000e+00 : f32
    %146 = vector.broadcast %cst_63 : f32 to vector<32x128xf32>
    %147 = arith.maximumf %145, %146 : vector<32x128xf32>
    %148 = arith.truncf %147 : vector<32x128xf32> to vector<32x128xbf16>
    %c0_64 = arith.constant 0 : index
    %c0_65 = arith.constant 0 : index
    %149 = vector.load %arg10[%c0_64, %c0_65] : memref<128x128xbf16, #tpu.memory_space<vmem>>, vector<128x128xbf16>
    %cst_66 = arith.constant dense<0.000000e+00> : vector<32x128xf32>
    %150 = tpu.matmul %148, %149, %cst_66 {dimension_numbers = #tpu.dot_dimension_numbers<[1], [0], [0], [1], [0, 0, 1, 1], [], []>} : vector<32x128xbf16>, vector<128x128xbf16>, vector<32x128xf32> -> vector<32x128xf32>
    %c0_67 = arith.constant 0 : index
    %c0_68 = arith.constant 0 : index
    %151 = vector.load %arg11[%c0_67, %c0_68] : memref<1x128xf32, #tpu.memory_space<vmem>>, vector<1x128xf32>
    %152 = vector.broadcast %151 : vector<1x128xf32> to vector<32x128xf32>
    %153 = arith.addf %150, %152 : vector<32x128xf32>
    %c0_69 = arith.constant 0 : index
    %c0_70 = arith.constant 0 : index
    %154 = vector.load %arg12[%c0_69, %c0_70] : memref<32x128xf32, #tpu.memory_space<vmem>>, vector<32x128xf32>
    tpu.vector_store %arg12[%c0_69, %c0_70], %153 {strides = array<i32>} : memref<32x128xf32, #tpu.memory_space<vmem>>, vector<32x128xf32>,
    return
  }
  func.func @transform_0(%arg0: i32) -> (i32, i32) {
    %c0_i32 = arith.constant 0 : i32
    %c0_i32_0 = arith.constant 0 : i32
    return %arg0, %c0_i32 : i32, i32
  }
  func.func @transform_1(%arg0: i32) -> (i32, i32) {
    %c0_i32 = arith.constant 0 : i32
    %c0_i32_0 = arith.constant 0 : i32
    return %arg0, %c0_i32 : i32, i32
  }
  func.func @transform_2(%arg0: i32) -> (i32, i32) {
    %c0_i32 = arith.constant 0 : i32
    %c0_i32_0 = arith.constant 0 : i32
    %c0_i32_1 = arith.constant 0 : i32
    return %c0_i32, %c0_i32_0 : i32, i32
  }
  func.func @transform_3(%arg0: i32) -> (i32, i32) {
    %c0_i32 = arith.constant 0 : i32
    %c0_i32_0 = arith.constant 0 : i32
    %c0_i32_1 = arith.constant 0 : i32
    return %c0_i32, %c0_i32_0 : i32, i32
  }
  func.func @transform_4(%arg0: i32) -> (i32, i32) {
    %c0_i32 = arith.constant 0 : i32
    %c0_i32_0 = arith.constant 0 : i32
    %c0_i32_1 = arith.constant 0 : i32
    return %c0_i32, %c0_i32_0 : i32, i32
  }
  func.func @transform_5(%arg0: i32) -> (i32, i32) {
    %c0_i32 = arith.constant 0 : i32
    %c0_i32_0 = arith.constant 0 : i32
    %c0_i32_1 = arith.constant 0 : i32
    return %c0_i32, %c0_i32_0 : i32, i32
  }
  func.func @transform_6(%arg0: i32) -> (i32, i32) {
    %c0_i32 = arith.constant 0 : i32
    %c0_i32_0 = arith.constant 0 : i32
    %c0_i32_1 = arith.constant 0 : i32
    return %c0_i32, %c0_i32_0 : i32, i32
  }
  func.func @transform_7(%arg0: i32) -> (i32, i32) {
    %c0_i32 = arith.constant 0 : i32
    %c0_i32_0 = arith.constant 0 : i32
    %c0_i32_1 = arith.constant 0 : i32
    return %c0_i32, %c0_i32_0 : i32, i32
  }
  func.func @transform_8(%arg0: i32) -> (i32, i32) {
    %c0_i32 = arith.constant 0 : i32
    %c0_i32_0 = arith.constant 0 : i32
    %c0_i32_1 = arith.constant 0 : i32
    return %c0_i32, %c0_i32_0 : i32, i32
  }
  func.func @transform_9(%arg0: i32) -> (i32, i32) {
    %c0_i32 = arith.constant 0 : i32
    %c0_i32_0 = arith.constant 0 : i32
    %c0_i32_1 = arith.constant 0 : i32
    return %c0_i32, %c0_i32_0 : i32, i32
  }
  func.func @transform_10(%arg0: i32) -> (i32, i32) {
    %c0_i32 = arith.constant 0 : i32
    %c0_i32_0 = arith.constant 0 : i32
    %c0_i32_1 = arith.constant 0 : i32
    return %c0_i32, %c0_i32_0 : i32, i32
  }
  func.func @transform_11(%arg0: i32) -> (i32, i32) {
    %c0_i32 = arith.constant 0 : i32
    %c0_i32_0 = arith.constant 0 : i32
    return %arg0, %c0_i32 : i32, i32
  }
}

</mosaic_0001>

<bundles_post_ra>
// kernel: tpu_custom_call.1
= control target key start
LH: loop header
LB: loop body
LE: loop exit
PB: predicated region body
PF: predicated region fallthrough
CT: control target
= control target key end

     0   :  { %16 = vsyncpa [#allocation4], 0  ;;  %s3207_s0 = inlined_call_operand.vmem [shape: s8[64,128], index: 0, kind: input, shape index: {}]   ;;  %s3208_s1 = inlined_call_operand.vmem [shape: f32[64,128], index: 1, kind: input, shape index: {}]   ;;  %s3209_s2 = inlined_call_operand.vmem [shape: bf16[128,32], index: 2, kind: input, shape index: {}]   ;;  %s3210_s3 = inlined_call_operand.hbm [shape: f32[8,128], index: 3, kind: input, shape index: {}]   ;;  %s3211_s4 = inlined_call_operand.hbm [shape: bf16[128,128], index: 4, kind: input, shape index: {}]   ;;  %s3212_s5 = inlined_call_operand.hbm [shape: f32[128,128], index: 5, kind: input, shape index: {}]   ;;  %s3213_s6 = inlined_call_operand.vmem [shape: f32[1,128], index: 6, kind: input, shape index: {}]   ;;  %s3214_s7 = inlined_call_operand.hbm [shape: bf16[128,128], index: 7, kind: input, shape index: {}]   ;;  %s3215_s8 = inlined_call_operand.vmem [shape: f32[1,128], index: 8, kind: input, shape index: {}]   ;;  %s3216_s9 = inlined_call_operand.hbm [shape: bf16[128,128], index: 9, kind: input, shape index: {}]   ;;  %s3217_s10 = inlined_call_operand.vmem [shape: f32[1,128], index: 10, kind: input, shape index: {}]   ;;  %s3218_s11 = inlined_call_operand.hbm [shape: f32[64,128], index: 11, kind: output, shape index: {}]  }
   0x1   :  { %17 = vsyncpa [#allocation7], 0 }
   0x2   :  { %18 = vsyncpa [#allocation10], 0 }
   0x3   :  { %19 = vsyncpa [#allocation5], 0 }
   0x4   :  { %21 = vsyncpa [#allocation5 + $0x1], 0  ;;  %s2746_s17 = smov 0   ;;  %s2748_s18 = smov 0  }
   0x5   :  { %s2750_s19 = smov 0   ;;  %s2752_s20 = smov 0  }
   0x6 LB: > { %3224 = sst [smem:[#allocation17_spill]] %s2658_s19  ;;  %s2767_s21 = sadd.s32 4294967295, %s2662_s20   ;;  %s2662_s20 = sphi %s2752_s20, %s3240_s20   ;;  %s2658_s19 = sphi %s2750_s19, %s3242_s19   ;;  %s2654_s18 = sphi %s2748_s18, %s3244_s18   ;;  %s2650_s17 = sphi %s2746_s17, %s3243_s17  }
   0x7   : > { %s1895_s22 = sadd.s32 4294967294, %s2662_s20   ;;  %s2771_s23 = sadd.s32 1, %s2662_s20  }
   0x8   : > { %3225 = sst [smem:[#allocation18_spill]] %s2771_s23  ;;  %s275_s24 = sadd.s32 1, %s2658_s19 }
   0x9   : > { %s272_s25 = ssub.s32 %s2662_s20, %s2771_s23  ;;  %p285_p0 = scmp.ne.s32.totalorder %s2658_s19, %s2654_s18 }
   0xa   : > { %p273_p1 = scmp.eq.s32.totalorder %s272_s25, 0  ;;  %p286_p2 = scmp.eq.s32.totalorder %s2767_s21, 1 }
   0xb   : > { %p291_p3 = scmp.ne.s32.totalorder %s2654_s18, %s2650_s17  ;;  %p292_p4 = scmp.eq.s32.totalorder %s1895_s22, 1 }
   0xc   : > { %s2782_s26 = scalar_select %p273_p1, %s2658_s19, %s275_s24  }
   0xd   : > { %p2784_p5 = por %p286_p2, %p285_p0  ;;  %p2788_p6 = por %p292_p4, %p291_p3 }
   0xe   : > { %3226 = sst [smem:[#allocation19_spill]] %s2782_s26  ;;  %p1896_p7 = scmp.ge.s32.totalorder %s2662_s20, 1 }
   0xf   : > { %s3228_s28 = scalar_select %p2788_p6, 1, 0 }
  0x10   : > { %p299_p8 = scmp.lt.s32.totalorder %s2662_s20, 3  ;;  %p3222_p9 = scmp.eq.s32.totalorder %s2767_s21, 0 }
  0x11   : > { %s2664_s30 = smov [#allocation6]   ;;  %s2665_s14 = smov [#allocation9]  }
  0x12   : > { %p2795_p10 = pnand %p1896_p7, %p299_p8  ;;  %s325_s12 = sshll.u32 %s2664_s30, 4  ;;  %s326_s12 = int_to_ptr.vmem [resolvable:$true] %s325_s12 }
  0x13   : > { %s354_s15 = sshll.u32 %s2665_s14, 4  ;;  %s2666_s16 = smov [#allocation3]   ;;  %s355_s15 = int_to_ptr.vmem [resolvable:$true] %s354_s15 }
  0x14   : > { %p2252_p11 = pneg %p2795_p10  ;;  %s315_s22 = sshll.u32 %s2666_s16, 4  ;;  %s316_s22 = int_to_ptr.vmem [resolvable:$true] %s315_s22 }
  0x15   : > { %s2471_s25 = scalar_lea.vmem %s326_s12, 1024  ;;  %p2479_p3 = scmp.lt.s32.totalorder %s326_s12, %s326_s12 }
  0x16   : > { %p2803_p12 = pnand %p3222_p9, %p2252_p11  ;;  %p2472_p0 = scmp.ne.s32.totalorder %s326_s12, %s2471_s25 }
  0x17   : > { %p2480_p4 = scmp.lt.s32.totalorder %s2471_s25, %s2471_s25 }
  0x18   : > { %p2809_p13 = pneg %p2803_p12 }
  0x19   : > { %p2481_p7 = por %p2480_p4, %p2479_p3 }
  0x1a   : > { %p2474_p1 = pnand %p2472_p0, %p2809_p13 }
  0x1c   : > { %p2475_p2 = pneg %p2474_p1 }
  0x1e   : > { %p2482_p8 = pnand %p2481_p7, %p2475_p2 }
  0x20   : > { %2485 = shalt.err (!%p2482_p8)
}
  0x21   : > { %s3223_s30 = smov 64   ;;  %s2668_s14 = smov 4  }
  0x22   : > { %2258 = dma.hbm_to_vmem [thread:$0]  (!%p2803_p12), %s3211_s4, 1024, %s326_s12, [#allocation7], %s3223_s30, %s3223_s30, %s2668_s14  }
  0x23   : > { %s2497_s19 = scalar_lea.vmem %s355_s15, 1024  ;;  %p2505_p3 = scmp.lt.s32.totalorder %s355_s15, %s355_s15 }
  0x24   : > { %p2498_p11 = scmp.ne.s32.totalorder %s355_s15, %s2497_s19  ;;  %p2506_p2 = scmp.lt.s32.totalorder %s2497_s19, %s2497_s19 }
  0x26   : > { %p2500_p0 = pnand %p2498_p11, %p2809_p13  ;;  %p2507_p4 = por %p2506_p2, %p2505_p3 }
  0x28   : > { %p2501_p1 = pneg %p2500_p0 }
  0x2a   : > { %p2508_p7 = pnand %p2507_p4, %p2501_p1 }
  0x2c   : > { %2511 = shalt.err (!%p2508_p7)
}
  0x2d   : > { %2264 = dma.hbm_to_vmem [thread:$0]  (!%p2803_p12), %s3214_s7, 1024, %s355_s15, [#allocation10], %s3223_s30, %s3223_s30, %s2668_s14  }
  0x2e   : > { %s2523_s26 = scalar_lea.vmem %s316_s22, 128  ;;  %p2531_p9 = scmp.lt.s32.totalorder %s316_s22, %s316_s22 }
  0x2f   : > { %p2524_p8 = scmp.ne.s32.totalorder %s316_s22, %s2523_s26  ;;  %p2532_p3 = scmp.lt.s32.totalorder %s2523_s26, %s2523_s26 }
  0x31   : > { %p2526_p11 = pnand %p2524_p8, %p2809_p13  ;;  %p2533_p1 = por %p2532_p3, %p2531_p9 }
  0x33   : > { %p2527_p0 = pneg %p2526_p11 }
  0x35   : > { %p2534_p2 = pnand %p2533_p1, %p2527_p0 }
  0x37   : > { %2537 = shalt.err (!%p2534_p2)
}
  0x38   : > { %2255 = dma.hbm_to_vmem [thread:$0]  (!%p2803_p12), %s3210_s3, 128, %s316_s22, [#allocation4]  }
  0x39   : > { %s2669_s23 = smov [#allocation8]  }
  0x3a   : > { %s338_s15 = sshll.u32 %s2669_s23, 4  ;;  %s339_s15 = int_to_ptr.vmem [resolvable:$true] %s338_s15 }
  0x3b   : > { %s2549_s16 = scalar_lea.vmem %s339_s15, 2048  ;;  %p2557_p11 = scmp.lt.s32.totalorder %s339_s15, %s339_s15 }
  0x3c   : > { %p2550_p4 = scmp.ne.s32.totalorder %s339_s15, %s2549_s16  ;;  %p2558_p6 = scmp.lt.s32.totalorder %s2549_s16, %s2549_s16 }
  0x3e   : > { %p2552_p7 = pnand %p2550_p4, %p2809_p13  ;;  %p2559_p9 = por %p2558_p6, %p2557_p11 }
  0x40   : > { %p2553_p8 = pneg %p2552_p7 }
  0x42   : > { %p2560_p0 = pnand %p2559_p9, %p2553_p8 }
  0x44   : > { %2563 = shalt.err (!%p2560_p0)
}
  0x45   : > { %s2670_s25 = smov 128   ;;  %s2671_s26 = smov 8  }
  0x46   : > { %2261 = dma.hbm_to_vmem [thread:$0]  (!%p2803_p12), %s3212_s5, 2048, %s339_s15, [#allocation7], %s2670_s25, %s2670_s25, %s2671_s26  }
  0x47   : > { %s2672_s12 = smov [#allocation11]  }
  0x48   : > { %s370_s23 = sshll.u32 %s2672_s12, 4  ;;  %s371_s23 = int_to_ptr.vmem [resolvable:$true] %s370_s23 }
  0x49   : > { %s2575_s30 = scalar_lea.vmem %s371_s23, 1024  ;;  %p2583_p6 = scmp.lt.s32.totalorder %s371_s23, %s371_s23 }
  0x4a   : > { %p2576_p3 = scmp.ne.s32.totalorder %s371_s23, %s2575_s30  ;;  %p2584_p4 = scmp.lt.s32.totalorder %s2575_s30, %s2575_s30 }
  0x4c   : > { %p2578_p1 = pnand %p2576_p3, %p2809_p13  ;;  %p2585_p7 = por %p2584_p4, %p2583_p6 }
  0x4e   : > { %p2579_p2 = pneg %p2578_p1 }
  0x50   : > { %p2586_p8 = pnand %p2585_p7, %p2579_p2 }
  0x52   : > { %2589 = shalt.err (!%p2586_p8)
}
  0x53   : > { %s3232_s16 = smov 64   ;;  %405 = sbr.rel (%p2795_p10) target bundleno = 1676 (0x68c), region = 64 }
  0x54   : > { %2267 = dma.hbm_to_vmem [thread:$0]  (!%p2803_p12), %s3216_s9, 1024, %s371_s23, [#allocation10], %s3232_s16, %s3232_s16, %s2668_s14  }
  0x55   : > { %p3233_p13 = scmp.eq.s32.totalorder (!%p2795_p10), %s2767_s21, 0 }
  0x58   : > { %2633 = dma.done.wait (%p3233_p13), [#allocation4], 128   ;;  %p3234_p11 = pmov %p3233_p13 }
  0x5a   : > { %2635 = vsyncadd (%p3234_p11), [#allocation4], 4294967168  ;;  %p3235_p9 = pmov %p3234_p11 }
  0x5c   : > { %2637 = dma.done.wait (%p3235_p9), [#allocation7], 3072   ;;  %p3236_p0 = pmov %p3235_p9 }
  0x5e   : > { %2639 = vsyncadd (%p3236_p0), [#allocation7], 4294964224  ;;  %p3237_p3 = pmov %p3236_p0 }
  0x5f   : > { %p3238_p12 = pmov %p3236_p0 }
  0x60   : > { %2641 = dma.done.wait (%p3237_p3), [#allocation10], 2048  }
  0x61   : > { %2643 = vsyncadd (%p3238_p12), [#allocation10], 4294965248  ;;  %s1911_s29 = sshll.u32 %s2767_s21, 2  ;;  %v2352_v0 = vld [vmem:[#allocation6 + $0x38] sm:$0xff]   ;;  %v2353_v1 = vld [vmem:[#allocation6 + $0x30] sm:$0xff]   ;;  %v2673_v32 = vmov 1  }
  0x62   : > { %p470_p10 = scmp.lt.s32.totalorder %s1911_s29, 7  ;;  %2052 = vmatprep.subr.bf16.mxu0 %v2352_v0  ;;  %v2354_v2 = vld [vmem:[#allocation6 + $0x28] sm:$0xff]   ;;  %v2355_v3 = vld [vmem:[#allocation6 + $0x20] sm:$0xff]   ;;  %v620_v7 = vld [vmem:[#allocation8 + $0x78] sm:$0xff]  ;;  %2337 = vset.pattern.permute.xlu1 %v2673_v32  ;;  %s2674_s23 = smov 120   ;;  %v2675_v35 = vmov 0  }
  0x63   : > { %2053 = vmatpush3.bf16.msra.mxu0 %v2352_v0  ;;  %2072 = vmatprep.subr.mxu1 %v620_v7  ;;  %v619_v8 = vld [vmem:[#allocation8 + $0x70] sm:$0xff]  ;;  %v2356_v9 = vld [vmem:[#allocation6 + $0x18] sm:$0xff]   ;;  %v618_v10 = vld [vmem:[#allocation8 + $0x68] sm:$0xff]  ;;  %s2676_s19 = smov 104   ;;  %s2677_s15 = smov 112   ;;  %v2678_v55 = vmov 3  }
  0x64   : > { %s3246_s29 = smov (!%p470_p10, %s1911_s29), 7  ;;  %2054 = vmatprep.subr.bf16.mxu0 %v2353_v1  ;;  %2073 = vmatpush3.msra.mxu1 %v620_v7  ;;  %v617_v11 = vld [vmem:[#allocation8 + $0x60] sm:$0xff]  ;;  %v2357_v12 = vld [vmem:[#allocation6 + $0x10] sm:$0xff]   ;;  %v616_v13 = vld [vmem:[#allocation8 + $0x58] sm:$0xff]  ;;  %v2679_v56 = vmov 2   ;;  %p465_p1 = scmp.lt.s32.totalorder %s2767_s21, 1 }
  0x65   : > { %s1912_s13 = sshll.u32 %s3246_s29, 3  ;;  %2074 = vmatprep.subr.mxu1 %v619_v8  ;;  %v615_v14 = vld [vmem:[#allocation8 + $0x50] sm:$0xff]  ;;  %v2358_v15 = vld [vmem:[#allocation6 + $0x8] sm:$0xff]   ;;  %v613_v17 = vld [vmem:[#allocation8 + $0x40] sm:$0xff]  ;;  %2336 = vset.pattern.permute.xlu0 %v2675_v35  ;;  %s2681_s25 = smov 8  }
  0x66   : > { %s2875_s14 = scalar_lea.vmem %s3208_s1, %s1912_s13  ;;  %2075 = vmatpush3.msra.mxu1 %v619_v8  ;;  %v614_v16 = vld [vmem:[#allocation8 + $0x48] sm:$0xff]  ;;  %v2359_v18 = vld [vmem:[#allocation6] sm:$0xff]   ;;  %v612_v19 = vld [vmem:[#allocation8 + $0x38] sm:$0xff]  ;;  %s2682_s26 = smov 16  }
  0x67   : > { %2055 = vmatpush3.bf16.msra.mxu0 %v2353_v1  ;;  %v486_v4 = vld [vmem:[%s2875_s14] sm:$0xff]  ;;  %v487_v5 = vld [vmem:[%s2875_s14 + $0x8] sm:$0xff]  ;;  %2076 = vmatprep.subr.mxu1 %v618_v10  ;;  %v611_v20 = vld [vmem:[#allocation8 + $0x30] sm:$0xff]  ;;  %s2683_s22 = smov 24  }
  0x68   : > { %2056 = vmatprep.subr.bf16.mxu0 %v2354_v2  ;;  %v490_v6 = vpack.c.bf16 %v487_v5, %v486_v4  ;;  %2077 = vmatpush3.msra.mxu1 %v618_v10  ;;  %v488_v21 = vld [vmem:[%s2875_s14 + $0x10] sm:$0xff]  ;;  %v489_v22 = vld [vmem:[%s2875_s14 + $0x18] sm:$0xff]  ;;  %v609_v25 = vld [vmem:[#allocation8 + $0x20] sm:$0xff] }
  0x69   : > { %2078 = vmatprep.subr.mxu1 %v617_v11  ;;  %v610_v23 = vld [vmem:[#allocation8 + $0x28] sm:$0xff]  ;;  %v491_v24 = vpack.c.bf16 %v489_v22, %v488_v21  ;;  %v608_v26 = vld [vmem:[#allocation8 + $0x18] sm:$0xff]  ;;  %v607_v27 = vld [vmem:[#allocation8 + $0x10] sm:$0xff] }
  0x6a   : > { %2068 = vmatprep.mubr.bf16.mxu0 %v490_v6  ;;  %2079 = vmatpush3.msra.mxu1 %v617_v11  ;;  %v606_v28 = vld [vmem:[#allocation8 + $0x8] sm:$0xff]  ;;  %v605_v29 = vld [vmem:[#allocation8] sm:$0xff]  ;;  %v2360_v30 = vld [vmem:[%s3209_s2 + $0x38] sm:$0xff]  }
  0x6b   : > { %2057 = vmatpush3.bf16.msra.mxu0 %v2354_v2  ;;  %2080 = vmatprep.subr.mxu1 %v616_v13  ;;  %v2361_v31 = vld [vmem:[%s3209_s2 + $0x30] sm:$0xff]   ;;  %v2362_v33 = vld [vmem:[%s3209_s2 + $0x28] sm:$0xff]   ;;  %v2363_v34 = vld [vmem:[%s3209_s2 + $0x20] sm:$0xff]  }
  0x6c   : > { %2058 = vmatprep.subr.bf16.mxu0 %v2355_v3  ;;  %2081 = vmatpush3.msra.mxu1 %v616_v13  ;;  %v2364_v36 = vld [vmem:[%s3209_s2 + $0x18] sm:$0xff]   ;;  %v2365_v37 = vld [vmem:[%s3209_s2 + $0x10] sm:$0xff]   ;;  %v2904_v38 = vld [vmem:[%s3209_s2 + $0x8] sm:$0xff]  }
  0x6d   : > { %2082 = vmatprep.subr.mxu1 %v615_v14  ;;  %1004 = vrot.lane.b32.xlu0 %v2360_v30, %s2674_s23  ;;  %v2909_v39 = vld [vmem:[%s3209_s2] sm:$0xff]  }
  0x6e   : > { %2083 = vmatpush3.msra.mxu1 %v615_v14  ;;  %1002 = vrot.lane.b32.xlu1 %v2361_v31, %s2674_s23  ;;  %v2961_v6 = vld [vmem:[#allocation3 + $0x1] ss:$0 sm:$0xff]  ;;  %v1921_v7 = vld [vmem:[#allocation3] ss:$0 sm:$0xff]  ;;  %v2966_v13 = vld [vmem:[#allocation3 + $0x2] ss:$0 sm:$0xff] }
  0x6f   : > { %2059 = vmatpush3.bf16.msra.mxu0 %v2355_v3  ;;  %2084 = vmatprep.subr.mxu1 %v614_v16 }
  0x70   : > { %2060 = vmatprep.subr.bf16.mxu0 %v2356_v9  ;;  %2085 = vmatpush3.msra.mxu1 %v614_v16 }
  0x71   : > { %2086 = vmatprep.subr.mxu1 %v613_v17  ;;  %998 = vrot.lane.b32.xlu0 %v2363_v34, %s2674_s23 }
  0x72   : > { %2087 = vmatpush3.msra.mxu1 %v613_v17  ;;  %1000 = vrot.lane.b32.xlu1 %v2362_v33, %s2674_s23 }
  0x73   : > { %2061 = vmatpush3.bf16.msra.mxu0 %v2356_v9  ;;  %2088 = vmatprep.subr.mxu1 %v612_v19 }
  0x74   : > { %2062 = vmatprep.subr.bf16.mxu0 %v2357_v12  ;;  %2089 = vmatpush3.msra.mxu1 %v612_v19 }
  0x75   : > { %2090 = vmatprep.subr.mxu1 %v611_v20  ;;  %994 = vrot.lane.b32.xlu0 %v2365_v37, %s2674_s23 }
  0x76   : > { %2091 = vmatpush3.msra.mxu1 %v611_v20  ;;  %996 = vrot.lane.b32.xlu1 %v2364_v36, %s2674_s23 }
  0x77   : > { %2063 = vmatpush3.bf16.msra.mxu0 %v2357_v12  ;;  %2092 = vmatprep.subr.mxu1 %v610_v23  ;;  %v2964_v12 = vld [vmem:[#allocation3 + $0x3] ss:$0 sm:$0xff] }
  0x78   : > { %2064 = vmatprep.subr.bf16.mxu0 %v2358_v15  ;;  %2093 = vmatpush3.msra.mxu1 %v610_v23 }
  0x79   : > { %2094 = vmatprep.subr.mxu1 %v609_v25  ;;  %990 = vrot.lane.b32.xlu0 %v2909_v39, %s2674_s23 }
  0x7a   : > { %2095 = vmatpush3.msra.mxu1 %v609_v25  ;;  %992 = vrot.lane.b32.xlu1 %v2904_v38, %s2674_s23  ;;  %s466_s23 = scalar_select %p465_p1, %s2767_s21, 1 }
  0x7b   : > { %2065 = vmatpush3.bf16.msra.mxu0 %v2358_v15  ;;  %2096 = vmatprep.subr.mxu1 %v608_v26 }
  0x7c   : > { %2066 = vmatprep.subr.bf16.mxu0 %v2359_v18  ;;  %2097 = vmatpush3.msra.mxu1 %v608_v26  ;;  %s1910_s29 = sshll.u32 %s466_s23, 3 }
  0x7d   : > { %2098 = vmatprep.subr.mxu1 %v607_v27  ;;  %1185 = vrot.lane.b32.xlu0 %v2360_v30, %s2677_s15  ;;  %s468_s30 = scalar_lea.vmem %s3207_s0, %s1910_s29 }
  0x7e   : > { %2099 = vmatpush3.msra.mxu1 %v607_v27  ;;  %1366 = vrot.lane.b32.xlu1 %v2360_v30, %s2676_s19 }
  0x7f   : > { %2067 = vmatpush3.bf16.msra.mxu0 %v2359_v18  ;;  %2100 = vmatprep.subr.mxu1 %v606_v28 }
  0x80   : > { %2101 = vmatpush3.msra.mxu1 %v606_v28  ;;  %2110 = vmatprep.subr.bf16.mxu0 %v2360_v30 }
  0x81   : > { %2102 = vmatprep.subr.mxu1 %v605_v29  ;;  %1364 = vrot.lane.b32.xlu0 %v2361_v31, %s2676_s19 }
  0x82   : > { %2069 = vmatmul.mubr.bf16.vlgmr.msra.gmra.mxu0 %v491_v24  ;;  %2103 = vmatpush3.msra.mxu1 %v605_v29 }
  0x83   : > { %2111 = vmatpush3.bf16.msra.mxu0 %v2360_v30  ;;  %1183 = vrot.lane.b32.xlu1 %v2361_v31, %s2677_s15 }
  0x84   : > { %2112 = vmatprep.subr.bf16.mxu0 %v2361_v31 }
  0x85   : > { %1362 = vrot.lane.b32.xlu0 %v2362_v33, %s2676_s19 }
  0x87   : > { %2113 = vmatpush3.bf16.msra.mxu0 %v2361_v31  ;;  %1181 = vrot.lane.b32.xlu1 %v2362_v33, %s2677_s15 }
  0x88   : > { %2114 = vmatprep.subr.bf16.mxu0 %v2362_v33 }
  0x89   : > { %1360 = vrot.lane.b32.xlu0 %v2363_v34, %s2676_s19 }
  0x8b   : > { %2115 = vmatpush3.bf16.msra.mxu0 %v2362_v33  ;;  %1179 = vrot.lane.b32.xlu1 %v2363_v34, %s2677_s15 }
  0x8c   : > { %2116 = vmatprep.subr.bf16.mxu0 %v2363_v34 }
  0x8d   : > { %1358 = vrot.lane.b32.xlu0 %v2364_v36, %s2676_s19 }
  0x8f   : > { %2117 = vmatpush3.bf16.msra.mxu0 %v2363_v34  ;;  %1177 = vrot.lane.b32.xlu1 %v2364_v36, %s2677_s15 }
  0x90   : > { %2118 = vmatprep.subr.bf16.mxu0 %v2364_v36 }
  0x91   : > { %1356 = vrot.lane.b32.xlu0 %v2365_v37, %s2676_s19 }
  0x93   : > { %2119 = vmatpush3.bf16.msra.mxu0 %v2364_v36  ;;  %1175 = vrot.lane.b32.xlu1 %v2365_v37, %s2677_s15 }
  0x94   : > { %2120 = vmatprep.subr.bf16.mxu0 %v2365_v37 }
  0x97   : > { %2121 = vmatpush3.bf16.msra.mxu0 %v2365_v37 }
  0x98   : > { %2122 = vmatprep.subr.bf16.mxu0 %v2904_v38 }
  0x9b   : > { %2123 = vmatpush3.bf16.msra.mxu0 %v2904_v38 }
  0x9c   : > { %2124 = vmatprep.subr.bf16.mxu0 %v2909_v39 }
  0x9f   : > { %2125 = vmatpush3.bf16.msra.mxu0 %v2909_v39 }
  0xdf   : > { %v1005_v44 = vpop.permute.xlu0 %1004 }
  0xe0   : > { %v1003_v45 = vpop.permute.xlu1 %1002  ;;  %2130 = vmatprep.subr.bf16.mxu1 %v1005_v44 }
  0xe3   : > { %v999_v47 = vpop.permute.xlu0 %998 }
  0xe4   : > { %v1001_v46 = vpop.permute.xlu1 %1000 }
  0xe7   : > { %v995_v48 = vpop.permute.xlu0 %994 }
  0xe8   : > { %v997_v49 = vpop.permute.xlu1 %996 }
  0xeb   : > { %v991_v50 = vpop.permute.xlu0 %990 }
  0xec   : > { %v993_v52 = vpop.permute.xlu1 %992 }
  0xef   : > { %v2929_v51 = vpop.permute.xlu0 %1185 }
  0xf0   : > { %2150 = vmatprep.subr.bf16.mxu0 %v2929_v51  ;;  %v2932_v53 = vpop.permute.xlu1 %1366 }
  0xf3   : > { %v2943_v61 = vpop.permute.xlu0 %1364 }
  0xf5   : > { %v2941_v60 = vpop.permute.xlu1 %1183 }
  0xf7   : > { %v2947_v63 = vpop.permute.xlu0 %1362 }
  0xf9   : > { %v2945_v62 = vpop.permute.xlu1 %1181 }
  0xfb   : > { %v2951_v1 = vpop.permute.xlu0 %1360 }
  0xfd   : > { %v2949_v0 = vpop.permute.xlu1 %1179 }
  0xff   : > { %v2955_v3 = vpop.permute.xlu0 %1358 }
 0x101   : > { %v2953_v2 = vpop.permute.xlu1 %1177 }
 0x103   : > { %v2959_v5 = vpop.permute.xlu0 %1356 }
 0x105   : > { %v2957_v4 = vpop.permute.xlu1 %1175 }
 0x142   : > { %v2070_v40 = vpop.f32.mrf.mxu0 }
 0x144   : > { %v590_v41 = vpop.f32.mrf.mxu0 }
 0x145   : > { %2104 = vmatprep.mubr.f32.mxu1 %v590_v41 }
 0x146   : > { %v2071_v42 = vpop.f32.mrf.mxu0 }
 0x148   : > { %v593_v43 = vpop.f32.mrf.mxu0 }
 0x149   : > { %2105 = vmatmul.mubr.f32.vlgmr.msra.gmra.mxu1 %v593_v43 }
 0x14a   : > { %2107 = vmatprep.mubr.f32.mxu1 %v2070_v40  ;;  %2131 = vmatpush3.bf16.msra.mxu1 %v1005_v44 }
 0x14b   : > { %2132 = vmatprep.subr.bf16.mxu1 %v1003_v45 }
 0x14d   : > { %2108 = vmatmul.mubr.f32.gmra.mxu1 %v2071_v42 }
 0x14e   : > { %2133 = vmatpush3.bf16.msra.mxu1 %v1003_v45 }
 0x14f   : > { %2134 = vmatprep.subr.bf16.mxu1 %v1001_v46 }
 0x152   : > { %2135 = vmatpush3.bf16.msra.mxu1 %v1001_v46 }
 0x153   : > { %2136 = vmatprep.subr.bf16.mxu1 %v999_v47 }
 0x156   : > { %2137 = vmatpush3.bf16.msra.mxu1 %v999_v47 }
 0x157   : > { %2138 = vmatprep.subr.bf16.mxu1 %v997_v49 }
 0x15a   : > { %2139 = vmatpush3.bf16.msra.mxu1 %v997_v49 }
 0x15b   : > { %2140 = vmatprep.subr.bf16.mxu1 %v995_v48 }
 0x15e   : > { %2141 = vmatpush3.bf16.msra.mxu1 %v995_v48 }
 0x15f   : > { %2142 = vmatprep.subr.bf16.mxu1 %v993_v52 }
 0x162   : > { %2143 = vmatpush3.bf16.msra.mxu1 %v993_v52 }
 0x163   : > { %2144 = vmatprep.subr.bf16.mxu1 %v991_v50 }
 0x166   : > { %2145 = vmatpush3.bf16.msra.mxu1 %v991_v50 }
 0x167   : > { %2170 = vmatprep.subr.bf16.mxu1 %v2932_v53 }
 0x209   : > { %v2106_v54 = vpop.f32.mrf.mxu1 }
 0x20a   : > { %925 = vperm.xlu1 %2337, %v2106_v54   ;;  %734 = vperm.xlu0 %2336, %v2106_v54  }
 0x20b   : > { %v687_v57 = vpop.f32.mrf.mxu1 }
 0x20d   : > { %v2109_v58 = vpop.f32.mrf.mxu1 }
 0x20e   : > { %2339 = vset.pattern.permute.xlu1 %v2678_v55  ;;  %2338 = vset.pattern.permute.xlu0 %v2679_v56 }
 0x20f   : > { %1287 = vperm.xlu1 %2339, %v2106_v54   ;;  %1106 = vperm.xlu0 %2338, %v2106_v54   ;;  %v697_v59 = vpop.f32.mrf.mxu1 }
 0x213   : > { %2342 = vset.pattern.permute.xlu1 %v2679_v56  ;;  %2340 = vset.pattern.permute.xlu0 %v2675_v35 }
 0x214   : > { %1102 = vperm.xlu1 %2342, %v687_v57   ;;  %729 = vperm.xlu0 %2340, %v687_v57  }
 0x218   : > { %2344 = vset.pattern.permute.xlu1 %v2675_v35  ;;  %2341 = vset.pattern.permute.xlu0 %v2673_v32 }
 0x219   : > { %921 = vperm.xlu0 %2341, %v687_v57   ;;  %744 = vperm.xlu1 %2344, %v2109_v58  }
 0x21d   : > { %2343 = vset.pattern.permute.xlu0 %v2678_v55  ;;  %2346 = vset.pattern.permute.xlu1 %v2679_v56 }
 0x21e   : > { %1283 = vperm.xlu0 %2343, %v687_v57   ;;  %1114 = vperm.xlu1 %2346, %v2109_v58  }
 0x222   : > { %2345 = vset.pattern.permute.xlu0 %v2673_v32  ;;  %2348 = vset.pattern.permute.xlu1 %v2675_v35 }
 0x223   : > { %933 = vperm.xlu0 %2345, %v2109_v58   ;;  %739 = vperm.xlu1 %2348, %v697_v59  }
 0x227   : > { %2347 = vset.pattern.permute.xlu0 %v2678_v55  ;;  %2349 = vset.pattern.permute.xlu1 %v2673_v32 }
 0x228   : > { %1295 = vperm.xlu0 %2347, %v2109_v58   ;;  %929 = vperm.xlu1 %2349, %v697_v59  }
 0x22c   : > { %2350 = vset.pattern.permute.xlu1 %v2679_v56 }
 0x22d   : > { %1110 = vperm.xlu1 %2350, %v697_v59  }
 0x231   : > { %2351 = vset.pattern.permute.xlu1 %v2678_v55 }
 0x232   : > { %1291 = vperm.xlu1 %2351, %v697_v59  }
 0x285   : > { %v926_v8 = vpop.permute.xlu1 %925  ;;  %v735_v9 = vpop.permute.xlu0 %734 }
 0x286   : > { %v941_v10 = vadd.f32 %v2961_v6, %v926_v8  ;;  %v752_v11 = vadd.f32 %v1921_v7, %v735_v9 }
 0x288   : > { %vm756_vm0 = vcmp.gt.f32.partialorder %v752_v11, 0.0  ;;  %v760_v14 = vmul.f32 0.2, %v752_v11  ;;  %vm945_vm1 = vcmp.gt.f32.partialorder %v941_v10, 0.0  ;;  %v949_v15 = vmul.f32 0.2, %v941_v10 }
 0x28a   : > { %v1288_v16 = vpop.permute.xlu1 %1287  ;;  %v1107_v17 = vpop.permute.xlu0 %1106  ;;  %v2968_v18 = vsel %vm756_vm0, %v752_v11, %v760_v14  ;;  %v2970_v19 = vsel %vm945_vm1, %v941_v10, %v949_v15 }
 0x28b   : > { %v1303_v20 = vadd.f32 %v2964_v12, %v1288_v16  ;;  %v1122_v21 = vadd.f32 %v2966_v13, %v1107_v17  ;;  %769 = vmax.xlane.f32.xlu0 %v2968_v18  ;;  %958 = vmax.xlane.f32.xlu1 %v2970_v19 }
 0x28d   : > { %vm1126_vm2 = vcmp.gt.f32.partialorder %v1122_v21, 0.0  ;;  %v1130_v22 = vmul.f32 0.2, %v1122_v21  ;;  %vm1307_vm3 = vcmp.gt.f32.partialorder %v1303_v20, 0.0  ;;  %v1311_v23 = vmul.f32 0.2, %v1303_v20 }
 0x28f   : > { %v1103_v24 = vpop.permute.xlu1 %1102  ;;  %v730_v25 = vpop.permute.xlu0 %729  ;;  %v2976_v26 = vsel %vm1126_vm2, %v1122_v21, %v1130_v22  ;;  %v2978_v27 = vsel %vm1307_vm3, %v1303_v20, %v1311_v23 }
 0x290   : > { %v1121_v28 = vadd.f32 %v2966_v13, %v1103_v24  ;;  %v751_v29 = vadd.f32 %v1921_v7, %v730_v25  ;;  %1139 = vmax.xlane.f32.xlu0 %v2976_v26  ;;  %1320 = vmax.xlane.f32.xlu1 %v2978_v27 }
 0x292   : > { %vm755_vm4 = vcmp.gt.f32.partialorder %v751_v29, 0.0  ;;  %v759_v30 = vmul.f32 0.2, %v751_v29  ;;  %v1129_v34 = vmul.f32 0.2, %v1121_v28  ;;  %vm1125_vm5 = vcmp.gt.f32.partialorder %v1121_v28, 0.0 }
 0x294   : > { %v922_v31 = vpop.permute.xlu0 %921  ;;  %v745_v32 = vpop.permute.xlu1 %744  ;;  %v2983_v33 = vsel %vm755_vm4, %v751_v29, %v759_v30  ;;  %v2987_v40 = vsel %vm1125_vm5, %v1121_v28, %v1129_v34 }
 0x295   : > { %v940_v35 = vadd.f32 %v2961_v6, %v922_v31  ;;  %v754_v36 = vadd.f32 %v1921_v7, %v745_v32  ;;  %767 = vmax.xlane.f32.xlu1 %v2983_v33 }
 0x297   : > { %vm944_vm6 = vcmp.gt.f32.partialorder %v940_v35, 0.0  ;;  %v948_v37 = vmul.f32 0.2, %v940_v35  ;;  %v762_v41 = vmul.f32 0.2, %v754_v36  ;;  %vm758_vm7 = vcmp.gt.f32.partialorder %v754_v36, 0.0 }
 0x299   : > { %v1284_v42 = vpop.permute.xlu0 %1283  ;;  %v1115_v43 = vpop.permute.xlu1 %1114  ;;  %1137 = vmax.xlane.f32.xlu1 %v2987_v40  ;;  %v2990_v44 = vsel %vm944_vm6, %v940_v35, %v948_v37  ;;  %v2994_v46 = vsel %vm758_vm7, %v754_v36, %v762_v41 }
 0x29a   : > { %v1302_v45 = vadd.f32 %v2964_v12, %v1284_v42  ;;  %956 = vmax.xlane.f32.xlu0 %v2990_v44  ;;  %v1124_v10 = vadd.f32 %v2966_v13, %v1115_v43  ;;  %v3044_v42 = vld [vmem:[%s468_s30] sm:$0xff] }
 0x29b   : > { %v479_v43 = vunpack.c.1.s8 %v3044_v42 }
 0x29c   : > { %vm1306_vm8 = vcmp.gt.f32.partialorder %v1302_v45, 0.0  ;;  %v1310_v47 = vmul.f32 0.2, %v1302_v45  ;;  %v1132_v15 = vmul.f32 0.2, %v1124_v10  ;;  %vm1128_vm12 = vcmp.gt.f32.partialorder %v1124_v10, 0.0 }
 0x29d   : > { %773 = vmax.xlane.f32.xlu1 %v2994_v46 }
 0x29e   : > { %v934_v48 = vpop.permute.xlu0 %933  ;;  %v740_v49 = vpop.permute.xlu1 %739  ;;  %v2997_v50 = vsel %vm1306_vm8, %v1302_v45, %v1310_v47  ;;  %v3018_v20 = vsel %vm1128_vm12, %v1124_v10, %v1132_v15  ;;  %v478_v10 = vunpack.c.0.s8 %v3044_v42  ;;  %vm914_vm8 = vcmask 64512  }
 0x29f   : > { %v943_v52 = vadd.f32 %v2961_v6, %v934_v48  ;;  %v753_v54 = vadd.f32 %v1921_v7, %v740_v49  ;;  %1318 = vmax.xlane.f32.xlu0 %v2997_v50  ;;  %v483_v49 = vcvt.s32.f32 %v479_v43 }
 0x2a1   : > { %vm947_vm9 = vcmp.gt.f32.partialorder %v943_v52, 0.0  ;;  %v951_v55 = vmul.f32 0.2, %v943_v52  ;;  %vm757_vm10 = vcmp.gt.f32.partialorder %v753_v54, 0.0  ;;  %v761_v56 = vmul.f32 0.2, %v753_v54 }
 0x2a3   : > { %v930_v57 = vpop.permute.xlu1 %929  ;;  %v3001_v58 = vsel %vm947_vm9, %v943_v52, %v951_v55  ;;  %v3003_v59 = vsel %vm757_vm10, %v753_v54, %v761_v56 }
 0x2a4   : > { %v942_v8 = vadd.f32 %v2961_v6, %v930_v57  ;;  %962 = vmax.xlane.f32.xlu1 %v3001_v58  ;;  %771 = vmax.xlane.f32.xlu0 %v3003_v59  ;;  %v1296_v6 = vpop.permute.xlu0 %1295 }
 0x2a5   : > { %v1305_v14 = vadd.f32 %v2964_v12, %v1296_v6 }
 0x2a6   : > { %vm946_vm11 = vcmp.gt.f32.partialorder %v942_v8, 0.0  ;;  %v950_v9 = vmul.f32 0.2, %v942_v8 }
 0x2a7   : > { %v1313_v21 = vmul.f32 0.2, %v1305_v14  ;;  %vm1309_vm13 = vcmp.gt.f32.partialorder %v1305_v14, 0.0 }
 0x2a8   : > { %v3008_v7 = vsel %vm946_vm11, %v942_v8, %v950_v9  ;;  %v1111_v11 = vpop.permute.xlu1 %1110 }
 0x2a9   : > { %960 = vmax.xlane.f32.xlu0 %v3008_v7  ;;  %v1123_v16 = vadd.f32 %v2966_v13, %v1111_v11  ;;  %v3022_v23 = vsel %vm1309_vm13, %v1305_v14, %v1313_v21 }
 0x2ab   : > { %vm1127_vm14 = vcmp.gt.f32.partialorder %v1123_v16, 0.0 }
 0x2ad   : > { %v1292_v17 = vpop.permute.xlu1 %1291 }
 0x2ae   : > { %v1304_v22 = vadd.f32 %v2964_v12, %v1292_v17  ;;  %v482_v17 = vcvt.s32.f32 %v478_v10 }
 0x2b0   : > { %v1312_v13 = vmul.f32 0.2, %v1304_v22  ;;  %vm1308_vm15 = vcmp.gt.f32.partialorder %v1304_v22, 0.0 }
 0x2b2   : > { %v3028_v25 = vsel %vm1308_vm15, %v1304_v22, %v1312_v13 }
 0x2b5   : > { %1173 = vrot.lane.b32.xlu1 %v2904_v38, %s2677_s15 }
 0x2bf   : > { %1354 = vrot.lane.b32.xlu0 %v2904_v38, %s2676_s19  ;;  %v1131_v38 = vmul.f32 0.2, %v1123_v16 }
 0x2c1   : > { %v3025_v24 = vsel %vm1127_vm14, %v1123_v16, %v1131_v38 }
 0x2d9   : > { %1143 = vmax.xlane.f32.xlu1 %v3018_v20 }
 0x2dd   : > { %1324 = vmax.xlane.f32.xlu1 %v3022_v23 }
 0x2de   : > { %1141 = vmax.xlane.f32.xlu0 %v3025_v24 }
 0x2e2   : > { %1322 = vmax.xlane.f32.xlu0 %v3028_v25 }
 0x2ee   : > { %1171 = vrot.lane.b32.xlu1 %v2909_v39, %s2677_s15 }
 0x2f8   : > { %1352 = vrot.lane.b32.xlu0 %v2909_v39, %s2676_s19 }
 0x314   : > { %v770_v12 = vpop.xlane.xlu0 %769  ;;  %v959_v28 = vpop.xlane.xlu1 %958 }
 0x315   : > { %v965_v29 = vsub.f32 %v2970_v19, %v959_v28  ;;  %v776_v31 = vsub.f32 %v2968_v18, %v770_v12 }
 0x317   : > { %v970_v30 = vmul.f32 1.442695, %v965_v29  ;;  %v781_v41 = vmul.f32 1.442695, %v776_v31 }
 0x319   : > { %v1140_v32 = vpop.xlane.xlu0 %1139  ;;  %v1321_v34 = vpop.xlane.xlu1 %1320  ;;  %2384 = vpow2.f32 %v970_v30 }
 0x31a   : > { %v1146_v35 = vsub.f32 %v2976_v26, %v1140_v32  ;;  %v1327_v36 = vsub.f32 %v2978_v27, %v1321_v34 }
 0x31c   : > { %v1151_v39 = vmul.f32 1.442695, %v1146_v35  ;;  %v1332_v37 = vmul.f32 1.442695, %v1327_v36 }
 0x31e   : > { %2386 = vpow2.f32 %v1151_v39  ;;  %v768_v19 = vpop.xlane.xlu1 %767 }
 0x31f   : > { %v775_v18 = vsub.f32 %v2983_v33, %v768_v19  ;;  %2388 = vpow2.f32 %v1332_v37  ;;  %v481_v37 = vunpack.c.3.s8 %v3044_v42 }
 0x320   : > { %2390 = vpow2.f32 %v781_v41  ;;  %v480_v41 = vunpack.c.2.s8 %v3044_v42 }
 0x321   : > { %v779_v26 = vmul.f32 1.442695, %v775_v18  ;;  %v3064_v18 = vcvt.s32.f32 %v481_v37 }
 0x322   : > { %v1138_v45 = vpop.xlane.xlu1 %1137  ;;  %v3066_v43 = vcvt.s32.f32 %v480_v41 }
 0x323   : > { %2392 = vpow2.f32 %v779_v26  ;;  %v1145_v27 = vsub.f32 %v2987_v40, %v1138_v45  ;;  %v957_v47 = vpop.xlane.xlu0 %956 }
 0x324   : > { %v964_v48 = vsub.f32 %v2990_v44, %v957_v47 }
 0x325   : > { %v1149_v52 = vmul.f32 1.442695, %v1145_v27 }
 0x326   : > { %v968_v54 = vmul.f32 1.442695, %v964_v48  ;;  %v774_v55 = vpop.xlane.xlu1 %773  ;;  %v2385_v56 = vpop.eup %2384 }
 0x327   : > { %2394 = vpow2.f32 %v1149_v52  ;;  %v778_v33 = vsub.f32 %v2994_v46, %v774_v55  ;;  %v977_v8 = vmul.f32 %v2385_v56, %v483_v49 }
 0x328   : > { %2396 = vpow2.f32 %v968_v54  ;;  %v1319_v57 = vpop.xlane.xlu0 %1318 }
 0x329   : > { %v1326_v9 = vsub.f32 %v2997_v50, %v1319_v57  ;;  %982 = vadd.xlane.f32.xlu0 %v977_v8  ;;  %v785_v6 = vmul.f32 1.442695, %v778_v33 }
 0x32b   : > { %v2387_v40 = vpop.eup %2386  ;;  %v1330_v11 = vmul.f32 1.442695, %v1326_v9 }
 0x32c   : > { %v1158_v44 = vmul.f32 %v2387_v40, %v483_v49  ;;  %v2389_v14 = vpop.eup %2388 }
 0x32d   : > { %2398 = vpow2.f32 %v1330_v11  ;;  %v772_v15 = vpop.xlane.xlu0 %771  ;;  %v963_v16 = vpop.xlane.xlu1 %962  ;;  %v1339_v12 = vmul.f32 %v2389_v14, %v483_v49 }
 0x32e   : > { %v2391_v21 = vpop.eup %2390  ;;  %v777_v22 = vsub.f32 %v3003_v59, %v772_v15  ;;  %v967_v46 = vsub.f32 %v3001_v58, %v963_v16  ;;  %1163 = vadd.xlane.f32.xlu1 %v1158_v44  ;;  %2400 = vpow2.f32 %v785_v6  ;;  %v2680_v16 = vmov 0.0  }
 0x32f   : > { %v3057_v29 = vmul.f32 %v2391_v21, %v483_v49  ;;  %724 = vst [vmem:[#allocation2 + $0x10] sm:$0xff] %v2680_v16  ;;  %722 = vst [vmem:[#allocation2] sm:$0xff] %v2680_v16 }
 0x330   : > { %v2393_v38 = vpop.eup %2392  ;;  %v783_v50 = vmul.f32 1.442695, %v777_v22  ;;  %v974_v13 = vmul.f32 1.442695, %v967_v46  ;;  %723 = vst [vmem:[#allocation2 + $0x8] sm:$0xff] %v2680_v16  ;;  %725 = vst [vmem:[#allocation2 + $0x18] sm:$0xff] %v2680_v16 }
 0x331   : > { %v3055_v28 = vmul.f32 %v2393_v38, %v482_v17 }
 0x332   : > { %2402 = vpow2.f32 %v783_v50  ;;  %v961_v30 = vpop.xlane.xlu0 %960  ;;  %1344 = vadd.xlane.f32.xlu1 %v1339_v12 }
 0x333   : > { %2404 = vpow2.f32 %v974_v13  ;;  %v966_v31 = vsub.f32 %v3008_v7, %v961_v30  ;;  %v799_v59 = vpack.c.bf16 %v3057_v29, %v3055_v28 }
 0x334   : > { %v2395_v58 = vpop.eup %2394 }
 0x335   : > { %v2397_v32 = vpop.eup %2396  ;;  %v972_v34 = vmul.f32 1.442695, %v966_v31  ;;  %2126 = vmatprep.mubr.bf16.mxu0 %v799_v59  ;;  %v1157_v35 = vmul.f32 %v2395_v58, %v482_v17 }
 0x336   : > { %v976_v36 = vmul.f32 %v2397_v32, %v482_v17 }
 0x337   : > { %2406 = vpow2.f32 %v972_v34  ;;  %1161 = vadd.xlane.f32.xlu0 %v1157_v35  ;;  %v1169_v52 = vpack.c.bf16 %v1158_v44, %v1157_v35 }
 0x338   : > { %980 = vadd.xlane.f32.xlu1 %v976_v36  ;;  %v988_v39 = vpack.c.bf16 %v977_v8, %v976_v36 }
 0x33a   : > { %v2399_v19 = vpop.eup %2398  ;;  %2146 = vmatprep.mubr.bf16.mxu1 %v988_v39 }
 0x33b   : > { %v1338_v7 = vmul.f32 %v2399_v19, %v482_v17  ;;  %v2401_v26 = vpop.eup %2400 }
 0x33c   : > { %v3072_v48 = vmul.f32 %v2401_v26, %v3064_v18 }
 0x33d   : > { %1342 = vadd.xlane.f32.xlu0 %v1338_v7  ;;  %v1350_v33 = vpack.c.bf16 %v1339_v12, %v1338_v7 }
 0x33f   : > { %v2403_v45 = vpop.eup %2402 }
 0x340   : > { %v2405_v27 = vpop.eup %2404  ;;  %v3069_v47 = vmul.f32 %v2403_v45, %v3066_v43 }
 0x341   : > { %v979_v49 = vmul.f32 %v2405_v27, %v3064_v18 }
 0x342   : > { %v800_v42 = vpack.c.bf16 %v3072_v48, %v3069_v47 }
 0x343   : > { %986 = vadd.xlane.f32.xlu1 %v979_v49 }
 0x344   : > { %v2407_v54 = vpop.eup %2406  ;;  %2127 = vmatmul.mubr.bf16.vlgmr.msra.gmra.mxu0 %v800_v42 }
 0x345   : > { %2151 = vmatpush3.bf16.msra.mxu0 %v2929_v51  ;;  %2166 = vmatprep.mubr.bf16.mxu0 %v1169_v52  ;;  %v978_v55 = vmul.f32 %v2407_v54, %v3066_v43  ;;  %v1174_v51 = vpop.permute.xlu1 %1173 }
 0x346   : > { %2152 = vmatprep.subr.bf16.mxu0 %v2941_v60 }
 0x347   : > { %v989_v56 = vpack.c.bf16 %v979_v49, %v978_v55  ;;  %984 = vadd.xlane.f32.xlu0 %v978_v55 }
 0x349   : > { %2153 = vmatpush3.bf16.msra.mxu0 %v2941_v60  ;;  %2147 = vmatmul.mubr.bf16.vlgmr.msra.gmra.mxu1 %v989_v56 }
 0x34a   : > { %2154 = vmatprep.subr.bf16.mxu0 %v2945_v62  ;;  %2171 = vmatpush3.bf16.msra.mxu1 %v2932_v53  ;;  %v1355_v53 = vpop.permute.xlu0 %1354 }
 0x34b   : > { %2172 = vmatprep.subr.bf16.mxu1 %v2943_v61  ;;  %2186 = vmatprep.mubr.bf16.mxu1 %v1350_v33 }
 0x34d   : > { %2155 = vmatpush3.bf16.msra.mxu0 %v2945_v62 }
 0x34e   : > { %2156 = vmatprep.subr.bf16.mxu0 %v2949_v0  ;;  %2173 = vmatpush3.bf16.msra.mxu1 %v2943_v61 }
 0x34f   : > { %2174 = vmatprep.subr.bf16.mxu1 %v2947_v63 }
 0x351   : > { %2157 = vmatpush3.bf16.msra.mxu0 %v2949_v0 }
 0x352   : > { %2158 = vmatprep.subr.bf16.mxu0 %v2953_v2  ;;  %2175 = vmatpush3.bf16.msra.mxu1 %v2947_v63 }
 0x353   : > { %2176 = vmatprep.subr.bf16.mxu1 %v2951_v1 }
 0x355   : > { %2159 = vmatpush3.bf16.msra.mxu0 %v2953_v2 }
 0x356   : > { %2160 = vmatprep.subr.bf16.mxu0 %v2957_v4  ;;  %2177 = vmatpush3.bf16.msra.mxu1 %v2951_v1 }
 0x357   : > { %2178 = vmatprep.subr.bf16.mxu1 %v2955_v3 }
 0x359   : > { %2161 = vmatpush3.bf16.msra.mxu0 %v2957_v4 }
 0x35a   : > { %2162 = vmatprep.subr.bf16.mxu0 %v1174_v51  ;;  %2179 = vmatpush3.bf16.msra.mxu1 %v2955_v3 }
 0x35b   : > { %2180 = vmatprep.subr.bf16.mxu1 %v2959_v5 }
 0x35d   : > { %2163 = vmatpush3.bf16.msra.mxu0 %v1174_v51 }
 0x35e   : > { %2181 = vmatpush3.bf16.msra.mxu1 %v2959_v5 }
 0x35f   : > { %2182 = vmatprep.subr.bf16.mxu1 %v1355_v53 }
 0x362   : > { %2183 = vmatpush3.bf16.msra.mxu1 %v1355_v53  ;;  %v1144_v60 = vpop.xlane.xlu1 %1143 }
 0x363   : > { %v1148_v61 = vsub.f32 %v3018_v20, %v1144_v60 }
 0x365   : > { %v1155_v62 = vmul.f32 1.442695, %v1148_v61 }
 0x366   : > { %v1325_v63 = vpop.xlane.xlu1 %1324 }
 0x367   : > { %2408 = vpow2.f32 %v1155_v62  ;;  %v1329_v0 = vsub.f32 %v3022_v23, %v1325_v63  ;;  %v1142_v1 = vpop.xlane.xlu0 %1141 }
 0x368   : > { %v1147_v2 = vsub.f32 %v3025_v24, %v1142_v1 }
 0x369   : > { %v1336_v3 = vmul.f32 1.442695, %v1329_v0 }
 0x36a   : > { %v1153_v4 = vmul.f32 1.442695, %v1147_v2  ;;  %v1172_v57 = vpop.permute.xlu1 %1171 }
 0x36b   : > { %2410 = vpow2.f32 %v1336_v3  ;;  %v1323_v8 = vpop.xlane.xlu0 %1322  ;;  %2164 = vmatprep.subr.bf16.mxu0 %v1172_v57 }
 0x36c   : > { %2412 = vpow2.f32 %v1153_v4  ;;  %v1328_v5 = vsub.f32 %v3028_v25, %v1323_v8  ;;  %2165 = vmatpush3.bf16.msra.mxu0 %v1172_v57 }
 0x36e   : > { %v1334_v9 = vmul.f32 1.442695, %v1328_v5 }
 0x36f   : > { %v1353_v20 = vpop.permute.xlu0 %1352 }
 0x370   : > { %2414 = vpow2.f32 %v1334_v9  ;;  %2184 = vmatprep.subr.bf16.mxu1 %v1353_v20 }
 0x371   : > { %2185 = vmatpush3.bf16.msra.mxu1 %v1353_v20 }
 0x374   : > { %v2409_v10 = vpop.eup %2408 }
 0x375   : > { %v1160_v23 = vmul.f32 %v2409_v10, %v3064_v18 }
 0x377   : > { %1167 = vadd.xlane.f32.xlu1 %v1160_v23 }
 0x378   : > { %v2411_v24 = vpop.eup %2410 }
 0x379   : > { %v2413_v40 = vpop.eup %2412  ;;  %v1341_v11 = vmul.f32 %v2411_v24, %v3064_v18 }
 0x37a   : > { %v1159_v6 = vmul.f32 %v2413_v40, %v3066_v43 }
 0x37b   : > { %1348 = vadd.xlane.f32.xlu1 %v1341_v11 }
 0x37c   : > { %v1170_v44 = vpack.c.bf16 %v1160_v23, %v1159_v6  ;;  %1165 = vadd.xlane.f32.xlu0 %v1159_v6 }
 0x37d   : > { %v2415_v25 = vpop.eup %2414 }
 0x37e   : > { %2167 = vmatmul.mubr.bf16.vlgmr.msra.gmra.mxu0 %v1170_v44  ;;  %v1340_v14 = vmul.f32 %v2415_v25, %v3066_v43 }
 0x37f   : > { %793 = vadd.xlane.f32.xlu1 %v3057_v29 }
 0x380   : > { %v1351_v15 = vpack.c.bf16 %v1341_v11, %v1340_v14  ;;  %1346 = vadd.xlane.f32.xlu0 %v1340_v14 }
 0x382   : > { %2187 = vmatmul.mubr.bf16.vlgmr.msra.gmra.mxu1 %v1351_v15 }
 0x383   : > { %797 = vadd.xlane.f32.xlu1 %v3072_v48 }
 0x384   : > { %791 = vadd.xlane.f32.xlu0 %v3055_v28 }
 0x388   : > { %795 = vadd.xlane.f32.xlu0 %v3069_v47 }
 0x3b2   : > { %v983_v17 = vpop.xlane.xlu0 %982 }
 0x3b3   : > { %vm1064_vm2 = vcmp.gt.f32.partialorder %v983_v17, 0.0 }
 0x3b4   : > { %v1068_v30 = vsel %vm1064_vm2, %v983_v17, 1.0  ;;  %vm1276_vm2 = vcmask 195712  }
 0x3b7   : > { %v3112_v21 = vpop.xlane.xlu1 %1163 }
 0x3b8   : > { %vm1245_vm12 = vcmp.gt.f32.partialorder %v3112_v21, 0.0 }
 0x3b9   : > { %v1249_v9 = vsel %vm1245_vm12, %v3112_v21, 1.0 }
 0x3bb   : > { %v3118_v38 = vpop.xlane.xlu1 %1344 }
 0x3bc   : > { %vm1426_vm14 = vcmp.gt.f32.partialorder %v3118_v38, 0.0 }
 0x3bd   : > { %v1430_v10 = vsel %vm1426_vm14, %v3118_v38, 1.0  ;;  %v2368_v38 = vld [vmem:[#allocation9 + $0x38] sm:$0xff]  }
 0x3be   : > { %2190 = vmatprep.subr.bf16.mxu0 %v2368_v38 }
 0x3bf   : > { %2191 = vmatpush3.bf16.msra.mxu0 %v2368_v38 }
 0x3c0   : > { %v3114_v22 = vpop.xlane.xlu0 %1161 }
 0x3c1   : > { %v981_v13 = vpop.xlane.xlu1 %980  ;;  %vm1244_vm10 = vcmp.gt.f32.partialorder %v3114_v22, 0.0 }
 0x3c2   : > { %vm1063_vm1 = vcmp.gt.f32.partialorder %v981_v13, 0.0  ;;  %v1248_v8 = vsel %vm1244_vm10, %v3114_v22, 1.0 }
 0x3c3   : > { %v1067_v29 = vsel %vm1063_vm1, %v981_v13, 1.0  ;;  %vm1095_vm1 = vcmask 130112  }
 0x3c6   : > { %v3116_v46 = vpop.xlane.xlu0 %1342 }
 0x3c7   : > { %vm1425_vm13 = vcmp.gt.f32.partialorder %v3116_v46, 0.0 }
 0x3c8   : > { %v1429_v20 = vsel %vm1425_vm13, %v3116_v46, 1.0 }
 0x3cc   : > { %v987_v12 = vpop.xlane.xlu1 %986 }
 0x3cd   : > { %vm1066_vm3 = vcmp.gt.f32.partialorder %v987_v12, 0.0 }
 0x3ce   : > { %v1070_v31 = vsel %vm1066_vm3, %v987_v12, 1.0  ;;  %vm1457_vm3 = vcmask 261312  }
 0x3d0   : > { %v985_v50 = vpop.xlane.xlu0 %984 }
 0x3d1   : > { %vm1065_vm0 = vcmp.gt.f32.partialorder %v985_v50, 0.0 }
 0x3d2   : > { %v1069_v28 = vsel %vm1065_vm0, %v985_v50, 1.0  ;;  %v2369_v50 = vld [vmem:[#allocation9 + $0x30] sm:$0xff]  }
 0x3d3   : > { %2416 = vrcp.f32 %v1069_v28  ;;  %2192 = vmatprep.subr.bf16.mxu0 %v2369_v50 }
 0x3d4   : > { %2418 = vrcp.f32 %v1067_v29  ;;  %2193 = vmatpush3.bf16.msra.mxu0 %v2369_v50  ;;  %v2457_v50 = vld [vmem:[%s2875_s14 + $0x8] sm:$0xff] }
 0x3d5   : > { %2420 = vrcp.f32 %v1068_v30 }
 0x3d6   : > { %2422 = vrcp.f32 %v1070_v31 }
 0x3e0   : > { %v2417_v35 = vpop.eup %2416 }
 0x3e1   : > { %v2419_v19 = vpop.eup %2418 }
 0x3e2   : > { %v2421_v47 = vpop.eup %2420 }
 0x3e3   : > { %v2423_v49 = vpop.eup %2422 }
 0x400   : > { %v3120_v59 = vpop.xlane.xlu1 %1167 }
 0x401   : > { %vm1247_vm11 = vcmp.gt.f32.partialorder %v3120_v59, 0.0 }
 0x402   : > { %v1251_v5 = vsel %vm1247_vm11, %v3120_v59, 1.0  ;;  %v2370_v59 = vld [vmem:[#allocation9 + $0x28] sm:$0xff]  }
 0x403   : > { %2194 = vmatprep.subr.bf16.mxu0 %v2370_v59 }
 0x404   : > { %v3122_v58 = vpop.xlane.xlu1 %1348  ;;  %v2128_v18 = vpop.f32.mrf.mxu0  ;;  %2195 = vmatpush3.bf16.msra.mxu0 %v2370_v59 }
 0x405   : > { %v1166_v32 = vpop.xlane.xlu0 %1165  ;;  %vm1428_vm0 = vcmp.gt.f32.partialorder %v3122_v58, 0.0 }
 0x406   : > { %v883_v54 = vpop.f32.mrf.mxu0  ;;  %vm1246_vm9 = vcmp.gt.f32.partialorder %v1166_v32, 0.0  ;;  %v1432_v40 = vsel %vm1428_vm0, %v3122_v58, 1.0 }
 0x407   : > { %v1250_v57 = vsel %vm1246_vm9, %v1166_v32, 1.0 }
 0x408   : > { %v794_v34 = vpop.xlane.xlu1 %793  ;;  %v2129_v53 = vpop.f32.mrf.mxu0 }
 0x409   : > { %vm899_vm4 = vcmp.gt.f32.partialorder %v794_v34, 0.0  ;;  %v3124_v36 = vpop.xlane.xlu0 %1346  ;;  %v2148_v39 = vpop.f32.mrf.mxu1 }
 0x40a   : > { %v903_v37 = vsel %vm899_vm4, %v794_v34, 1.0  ;;  %v1077_v41 = vmul.f32 %v2417_v35, %v2148_v39  ;;  %v886_v61 = vpop.f32.mrf.mxu0  ;;  %vm1427_vm15 = vcmp.gt.f32.partialorder %v3124_v36, 0.0 }
 0x40b   : > { %2424 = vrcp.f32 %v903_v37  ;;  %v1048_v7 = vpop.f32.mrf.mxu1  ;;  %v1431_v23 = vsel %vm1427_vm15, %v3124_v36, 1.0  ;;  %v2371_v36 = vld [vmem:[#allocation9 + $0x20] sm:$0xff]  }
 0x40c   : > { %v1075_v43 = vmul.f32 %v2419_v19, %v1048_v7  ;;  %v798_v26 = vpop.xlane.xlu1 %797  ;;  %1087 = vrot.lane.b32.xlu1 %v1077_v41, %s2681_s25  ;;  %2196 = vmatprep.subr.bf16.mxu0 %v2371_v36  ;;  %v2372_v41 = vld [vmem:[#allocation9 + $0x18] sm:$0xff]   ;;  %v2373_v19 = vld [vmem:[#allocation9 + $0x10] sm:$0xff]   ;;  %v2374_v7 = vld [vmem:[#allocation9 + $0x8] sm:$0xff]  }
 0x40d   : > { %vm901_vm5 = vcmp.gt.f32.partialorder %v798_v26, 0.0  ;;  %v2149_v45 = vpop.f32.mrf.mxu1  ;;  %v792_v27 = vpop.xlane.xlu0 %791  ;;  %2197 = vmatpush3.bf16.msra.mxu0 %v2371_v36  ;;  %v2382_v36 = vld [vmem:[#allocation11 + $0x8] sm:$0xff]  }
 0x40e   : > { %v905_v48 = vsel %vm901_vm5, %v798_v26, 1.0  ;;  %vm898_vm6 = vcmp.gt.f32.partialorder %v792_v27, 0.0  ;;  %1083 = vrot.lane.b32.xlu0 %v1075_v43, %s2681_s25  ;;  %v1078_v55 = vmul.f32 %v2423_v49, %v2149_v45  ;;  %2198 = vmatprep.subr.bf16.mxu0 %v2372_v41  ;;  %v2376_v43 = vld [vmem:[#allocation11 + $0x38] sm:$0xff]   ;;  %v2377_v26 = vld [vmem:[#allocation11 + $0x30] sm:$0xff]   ;;  %v2378_v45 = vld [vmem:[#allocation11 + $0x28] sm:$0xff]  }
 0x40f   : > { %2426 = vrcp.f32 %v905_v48  ;;  %v902_v42 = vsel %vm898_vm6, %v792_v27, 1.0  ;;  %v1051_v52 = vpop.f32.mrf.mxu1  ;;  %2210 = vmatprep.subr.bf16.mxu1 %v2376_v43  ;;  %v2379_v27 = vld [vmem:[#allocation11 + $0x20] sm:$0xff]  }
 0x410   : > { %2428 = vrcp.f32 %v902_v42  ;;  %v1076_v56 = vmul.f32 %v2421_v47, %v1051_v52  ;;  %2211 = vmatpush3.bf16.msra.mxu1 %v2376_v43  ;;  %v2380_v47 = vld [vmem:[#allocation11 + $0x18] sm:$0xff]  }
 0x411   : > { %v796_v33 = vpop.xlane.xlu0 %795  ;;  %2199 = vmatpush3.bf16.msra.mxu0 %v2372_v41  ;;  %2212 = vmatprep.subr.bf16.mxu1 %v2377_v26 }
 0x412   : > { %vm900_vm7 = vcmp.gt.f32.partialorder %v796_v33, 0.0  ;;  %1085 = vrot.lane.b32.xlu1 %v1076_v56, %s2681_s25  ;;  %1089 = vrot.lane.b32.xlu0 %v1078_v55, %s2681_s25 }
 0x413   : > { %v904_v51 = vsel %vm900_vm7, %v796_v33, 1.0  ;;  %2200 = vmatprep.subr.bf16.mxu0 %v2373_v19 }
 0x414   : > { %2430 = vrcp.f32 %v904_v51  ;;  %2213 = vmatpush3.bf16.msra.mxu1 %v2377_v26 }
 0x415   : > { %2432 = vrcp.f32 %v1250_v57  ;;  %2201 = vmatpush3.bf16.msra.mxu0 %v2373_v19  ;;  %2214 = vmatprep.subr.bf16.mxu1 %v2378_v45  ;;  %v1938_v19 = vld [vmem:[%s3215_s8] ss:$0 sm:$0xff] }
 0x416   : > { %2434 = vrcp.f32 %v1248_v8  ;;  %2202 = vmatprep.subr.bf16.mxu0 %v2374_v7 }
 0x417   : > { %2436 = vrcp.f32 %v1251_v5 }
 0x418   : > { %v2425_v60 = vpop.eup %2424  ;;  %2438 = vrcp.f32 %v1249_v9  ;;  %2215 = vmatpush3.bf16.msra.mxu1 %v2378_v45 }
 0x419   : > { %v911_v62 = vmul.f32 %v2425_v60, %v886_v61  ;;  %2440 = vrcp.f32 %v1429_v20  ;;  %2203 = vmatpush3.bf16.msra.mxu0 %v2374_v7  ;;  %2216 = vmatprep.subr.bf16.mxu1 %v2379_v27  ;;  %v1933_v61 = vld [vmem:[%s3213_s6] ss:$0 sm:$0xff] }
 0x41a   : > { %2442 = vrcp.f32 %v1430_v10 }
 0x41b   : > { %916 = vst.msk [vmem:[#allocation2 + $0x8] sm:$0xff] %vm914_vm8, %v911_v62  ;;  %2444 = vrcp.f32 %v1431_v23 }
 0x41c   : > { %v2427_v63 = vpop.eup %2426  ;;  %2446 = vrcp.f32 %v1432_v40  ;;  %2217 = vmatpush3.bf16.msra.mxu1 %v2379_v27 }
 0x41d   : > { %v2429_v0 = vpop.eup %2428  ;;  %v913_v1 = vmul.f32 %v2427_v63, %v2129_v53  ;;  %2218 = vmatprep.subr.bf16.mxu1 %v2380_v47 }
 0x41e   : > { %v910_v2 = vmul.f32 %v2429_v0, %v883_v54 }
 0x41f   : > { %918 = vst.msk [vmem:[#allocation2 + $0x18] sm:$0xff] %vm914_vm8, %v913_v1 }
 0x420   : > { %915 = vst.msk [vmem:[#allocation2] sm:$0xff] %vm914_vm8, %v910_v2  ;;  %2219 = vmatpush3.bf16.msra.mxu1 %v2380_v47 }
 0x421   : > { %v2431_v3 = vpop.eup %2430 }
 0x422   : > { %v912_v4 = vmul.f32 %v2431_v3, %v2128_v18  ;;  %v2433_v24 = vpop.eup %2432  ;;  %v2375_v18 = vld [vmem:[#allocation9] sm:$0xff]  }
 0x423   : > { %v2435_v25 = vpop.eup %2434  ;;  %2204 = vmatprep.subr.bf16.mxu0 %v2375_v18 }
 0x424   : > { %917 = vst.msk [vmem:[#allocation2 + $0x10] sm:$0xff] %vm914_vm8, %v912_v4  ;;  %v2437_v14 = vpop.eup %2436  ;;  %2205 = vmatpush3.bf16.msra.mxu0 %v2375_v18 }
 0x425   : > { %v2439_v13 = vpop.eup %2438 }
 0x426   : > { %v2441_v12 = vpop.eup %2440 }
 0x427   : > { %v2443_v58 = vpop.eup %2442 }
 0x428   : > { %v2445_v32 = vpop.eup %2444 }
 0x429   : > { %v2447_v39 = vpop.eup %2446 }
 0x43e   : > { %v2168_v11 = vpop.f32.mrf.mxu0 }
 0x43f   : > { %v1258_v6 = vmul.f32 %v2433_v24, %v2168_v11 }
 0x440   : > { %v1229_v44 = vpop.f32.mrf.mxu0 }
 0x441   : > { %1268 = vrot.lane.b32.xlu1 %v1258_v6, %s2682_s26  ;;  %v1256_v17 = vmul.f32 %v2435_v25, %v1229_v44 }
 0x442   : > { %v2169_v15 = vpop.f32.mrf.mxu0  ;;  %v2188_v16 = vpop.f32.mrf.mxu1 }
 0x443   : > { %v1259_v21 = vmul.f32 %v2437_v14, %v2169_v15  ;;  %v1439_v34 = vmul.f32 %v2445_v32, %v2188_v16 }
 0x444   : > { %v1232_v22 = vpop.f32.mrf.mxu0  ;;  %v1410_v46 = vpop.f32.mrf.mxu1 }
 0x445   : > { %1264 = vrot.lane.b32.xlu1 %v1256_v17, %s2682_s26  ;;  %1270 = vrot.lane.b32.xlu0 %v1259_v21, %s2682_s26  ;;  %v1257_v29 = vmul.f32 %v2439_v13, %v1232_v22  ;;  %v1437_v30 = vmul.f32 %v2441_v12, %v1410_v46  ;;  %v2456_v46 = vld [vmem:[%s2875_s14] sm:$0xff] }
 0x446   : > { %v2189_v28 = vpop.f32.mrf.mxu1 }
 0x447   : > { %v1440_v37 = vmul.f32 %v2447_v39, %v2189_v28  ;;  %v2383_v39 = vld [vmem:[#allocation11] sm:$0xff]  }
 0x448   : > { %v1413_v31 = vpop.f32.mrf.mxu1 }
 0x449   : > { %1445 = vrot.lane.b32.xlu1 %v1437_v30, %s2683_s22  ;;  %1266 = vrot.lane.b32.xlu0 %v1257_v29, %s2682_s26  ;;  %v1438_v35 = vmul.f32 %v2443_v58, %v1413_v31  ;;  %v2458_v31 = vld [vmem:[%s2875_s14 + $0x10] sm:$0xff]  ;;  %v2459_v58 = vld [vmem:[%s2875_s14 + $0x18] sm:$0xff]  ;;  %s462_s14 = sand.u32 1, %s2654_s18   ;;  %s1961_s26 = sshll.u32 %s2767_s21, 9 }
 0x44a   : > { %s1909_s23 = sshll.u32 %s462_s14, 5  ;;  %s3164_s16 = scalar_lea.hbm %s3218_s11, %s1961_s26 }
 0x44b   : > { %s464_s24 = scalar_lea.vmem [#allocation12], %s1909_s23  ;;  %s3166_s19 = scalar_lea.sflag [#allocation5], %s462_s14 }
 0x44c   : > { %s1771_s30 = sshll.u32 %s464_s24, 4  ;;  %s2684_s21 = smov [#allocation12]   ;;  %s3159_s30 = int_to_ptr.vmem [resolvable:$true] %s1771_s30 }
 0x44d   : > { %1449 = vrot.lane.b32.xlu1 %v1439_v34, %s2683_s22  ;;  %1447 = vrot.lane.b32.xlu0 %v1438_v35, %s2683_s22  ;;  %v2381_v35 = vld [vmem:[#allocation11 + $0x10] sm:$0xff]   ;;  %s2590_s15 = scalar_lea.vmem %s3159_s30, 512  ;;  %s2594_s23 = sshll.u32 %s2684_s21, 4  ;;  %s2595_s23 = int_to_ptr.vmem [resolvable:$false] %s2594_s23 }
 0x44e   : > { %2220 = vmatprep.subr.bf16.mxu1 %v2381_v35  ;;  %p2591_p2 = scmp.ne.s32.totalorder %s3159_s30, %s2590_s15  ;;  %s2596_s29 = scalar_lea.vmem %s2595_s23, 1024 }
 0x44f   : > { %2221 = vmatpush3.bf16.msra.mxu1 %v2381_v35  ;;  %p2597_p7 = scmp.lt.s32.totalorder %s3159_s30, %s2595_s23  ;;  %p2598_p8 = scmp.lt.s32.totalorder %s2596_s29, %s2590_s15 }
 0x450   : > { %2222 = vmatprep.subr.bf16.mxu1 %v2382_v36  ;;  %p2592_p6 = pnand %p2591_p2, %p2784_p5 }
 0x451   : > { %1451 = vrot.lane.b32.xlu0 %v1440_v37, %s2683_s22  ;;  %p2599_p13 = por %p2598_p8, %p2597_p7 }
 0x452   : > { %p2593_p4 = pneg %p2592_p6 }
 0x453   : > { %2223 = vmatpush3.bf16.msra.mxu1 %v2382_v36 }
 0x454   : > { %2224 = vmatprep.subr.bf16.mxu1 %v2383_v39  ;;  %p2600_p11 = pnand %p2599_p13, %p2593_p4 }
 0x457   : > { %2225 = vmatpush3.bf16.msra.mxu1 %v2383_v39 }
 0x47e   : > { %v1088_v48 = vpop.permute.xlu1 %1087 }
 0x47f   : > { %1098 = vst.msk [vmem:[#allocation2 + $0x10] sm:$0xff] %vm1095_vm1, %v1088_v48 }
 0x480   : > { %v1084_v49 = vpop.permute.xlu0 %1083 }
 0x481   : > { %1096 = vst.msk [vmem:[#allocation2] sm:$0xff] %vm1095_vm1, %v1084_v49 }
 0x484   : > { %v1086_v42 = vpop.permute.xlu1 %1085  ;;  %v1090_v52 = vpop.permute.xlu0 %1089 }
 0x485   : > { %1097 = vst.msk [vmem:[#allocation2 + $0x8] sm:$0xff] %vm1095_vm1, %v1086_v42  ;;  %1099 = vst.msk [vmem:[#allocation2 + $0x18] sm:$0xff] %vm1095_vm1, %v1090_v52 }
 0x4b3   : > { %v1269_v54 = vpop.permute.xlu1 %1268 }
 0x4b4   : > { %1279 = vst.msk [vmem:[#allocation2 + $0x10] sm:$0xff] %vm1276_vm2, %v1269_v54 }
 0x4b7   : > { %v1265_v55 = vpop.permute.xlu1 %1264  ;;  %v1271_v56 = vpop.permute.xlu0 %1270 }
 0x4b8   : > { %1277 = vst.msk [vmem:[#allocation2] sm:$0xff] %vm1276_vm2, %v1265_v55  ;;  %1280 = vst.msk [vmem:[#allocation2 + $0x18] sm:$0xff] %vm1276_vm2, %v1271_v56  ;;  %v1947_v55 = vld [vmem:[%s3217_s10] ss:$0 sm:$0xff] }
 0x4bb   : > { %v1446_v33 = vpop.permute.xlu1 %1445  ;;  %v1267_v51 = vpop.permute.xlu0 %1266 }
 0x4bc   : > { %1458 = vst.msk [vmem:[#allocation2] sm:$0xff] %vm1457_vm3, %v1446_v33 }
 0x4bd   : > { %1278 = vst.msk [vmem:[#allocation2 + $0x8] sm:$0xff] %vm1276_vm2, %v1267_v51 }
 0x4bf   : > { %v1450_v53 = vpop.permute.xlu1 %1449  ;;  %v1448_v60 = vpop.permute.xlu0 %1447 }
 0x4c0   : > { %1460 = vst.msk [vmem:[#allocation2 + $0x10] sm:$0xff] %vm1457_vm3, %v1450_v53  ;;  %1459 = vst.msk [vmem:[#allocation2 + $0x8] sm:$0xff] %vm1457_vm3, %v1448_v60 }
 0x4c3   : > { %v1452_v62 = vpop.permute.xlu0 %1451  ;;  %v1462_v63 = vld [vmem:[#allocation2] sm:$0xff] }
 0x4c4   : > { %1461 = vst.msk [vmem:[#allocation2 + $0x18] sm:$0xff] %vm1457_vm3, %v1452_v62  ;;  %v1473_v0 = vadd.f32 %v1933_v61, %v1462_v63 }
 0x4c6   : > { %v1481_v1 = vmin.f32 %v1473_v0, 0.0  ;;  %vm1477_vm4 = vcmp.gt.f32.partialorder %v1473_v0, 0.0 }
 0x4c7   : > { %v1463_v2 = vld [vmem:[#allocation2 + $0x8] sm:$0xff]  ;;  %v1464_v3 = vld [vmem:[#allocation2 + $0x10] sm:$0xff] }
 0x4c8   : > { %v1474_v4 = vadd.f32 %v1933_v61, %v1463_v2  ;;  %v1485_v57 = vmul.f32 1.442695, %v1481_v1  ;;  %v1475_v8 = vadd.f32 %v1933_v61, %v1464_v3 }
 0x4ca   : > { %v1482_v5 = vmin.f32 %v1474_v4, 0.0  ;;  %2448 = vpow2.f32 %v1485_v57  ;;  %v1483_v20 = vmin.f32 %v1475_v8, 0.0  ;;  %vm1478_vm5 = vcmp.gt.f32.partialorder %v1474_v4, 0.0 }
 0x4cb   : > { %v1465_v9 = vld [vmem:[#allocation2 + $0x18] sm:$0xff]  ;;  %vm1479_vm6 = vcmp.gt.f32.partialorder %v1475_v8, 0.0 }
 0x4cc   : > { %v1487_v10 = vmul.f32 1.442695, %v1482_v5  ;;  %v1476_v23 = vadd.f32 %v1933_v61, %v1465_v9  ;;  %v1489_v24 = vmul.f32 1.442695, %v1483_v20 }
 0x4ce   : > { %2450 = vpow2.f32 %v1487_v10  ;;  %v1484_v40 = vmin.f32 %v1476_v23, 0.0  ;;  %vm1480_vm7 = vcmp.gt.f32.partialorder %v1476_v23, 0.0 }
 0x4cf   : > { %2452 = vpow2.f32 %v1489_v24 }
 0x4d0   : > { %v1491_v11 = vmul.f32 1.442695, %v1484_v40 }
 0x4d2   : > { %2454 = vpow2.f32 %v1491_v11 }
 0x4d7   : > { %v2449_v6 = vpop.eup %2448 }
 0x4d8   : > { %v1934_v44 = vadd.f32 -1.0, %v2449_v6 }
 0x4da   : > { %v1497_v16 = vsel %vm1477_vm4, %v1473_v0, %v1934_v44 }
 0x4db   : > { %v2451_v25 = vpop.eup %2450  ;;  %v1501_v38 = vadd.f32 %v2456_v46, %v1497_v16 }
 0x4dc   : > { %v2453_v14 = vpop.eup %2452  ;;  %v1935_v15 = vadd.f32 -1.0, %v2451_v25 }
 0x4dd   : > { %v1936_v17 = vadd.f32 -1.0, %v2453_v14 }
 0x4de   : > { %v1498_v21 = vsel %vm1478_vm5, %v1474_v4, %v1935_v15 }
 0x4df   : > { %v2455_v22 = vpop.eup %2454  ;;  %v1502_v13 = vadd.f32 %v2457_v50, %v1498_v21  ;;  %v1499_v28 = vsel %vm1479_vm6, %v1475_v8, %v1936_v17 }
 0x4e0   : > { %v1937_v12 = vadd.f32 -1.0, %v2455_v22  ;;  %v1503_v59 = vadd.f32 %v2458_v31, %v1499_v28 }
 0x4e1   : > { %v1505_v29 = vpack.c.bf16 %v1502_v13, %v1501_v38 }
 0x4e2   : > { %v1500_v30 = vsel %vm1480_vm7, %v1476_v23, %v1937_v12 }
 0x4e3   : > { %2206 = vmatprep.mubr.bf16.mxu0 %v1505_v29  ;;  %v1504_v32 = vadd.f32 %v2459_v58, %v1500_v30 }
 0x4e5   : > { %v1506_v34 = vpack.c.bf16 %v1504_v32, %v1503_v59 }
 0x4e7   : > { %2207 = vmatmul.mubr.bf16.vlgmr.msra.gmra.mxu0 %v1506_v34 }
 0x5a7   : > { %v2208_v37 = vpop.f32.mrf.mxu0 }
 0x5a8   : > { %v1621_v26 = vadd.f32 %v2208_v37, %v1938_v19 }
 0x5a9   : > { %v1612_v41 = vpop.f32.mrf.mxu0 }
 0x5aa   : > { %v1613_v18 = vadd.f32 %v1938_v19, %v1612_v41  ;;  %v1629_v42 = vmax.f32 %v1621_v26, 0.0 }
 0x5ab   : > { %v2209_v7 = vpop.f32.mrf.mxu0 }
 0x5ac   : > { %v1624_v43 = vadd.f32 %v2209_v7, %v1938_v19  ;;  %v1627_v48 = vmax.f32 %v1613_v18, 0.0 }
 0x5ad   : > { %v1615_v45 = vpop.f32.mrf.mxu0 }
 0x5ae   : > { %v1616_v27 = vadd.f32 %v1938_v19, %v1615_v45  ;;  %v1630_v47 = vmax.f32 %v1624_v43, 0.0 }
 0x5b0   : > { %v1628_v49 = vmax.f32 %v1616_v27, 0.0  ;;  %v1632_v54 = vpack.c.bf16 %v1630_v47, %v1629_v42 }
 0x5b2   : > { %v1631_v52 = vpack.c.bf16 %v1628_v49, %v1627_v48 }
 0x5b4   : > { %2226 = vmatprep.mubr.bf16.mxu1 %v1631_v52 }
 0x5b5   : > { %2227 = vmatmul.mubr.bf16.vlgmr.msra.gmra.mxu1 %v1632_v54 }
 0x675   : > { %v2228_v56 = vpop.f32.mrf.mxu1 }
 0x676   : > { %v1747_v33 = vadd.f32 %v2228_v56, %v1947_v55 }
 0x677   : > { %v1738_v51 = vpop.f32.mrf.mxu1 }
 0x678   : > { %1755 = vst [vmem:[%s464_s24 + $0x10] sm:$0xff] %v1747_v33  ;;  %v1739_v53 = vadd.f32 %v1947_v55, %v1738_v51 }
 0x679   : > { %v2229_v60 = vpop.f32.mrf.mxu1 }
 0x67a   : > { %1753 = vst [vmem:[%s464_s24] sm:$0xff] %v1739_v53  ;;  %v1750_v61 = vadd.f32 %v2229_v60, %v1947_v55 }
 0x67b   : > { %v1741_v62 = vpop.f32.mrf.mxu1 }
 0x67c   : > { %1756 = vst [vmem:[%s464_s24 + $0x18] sm:$0xff] %v1750_v61  ;;  %v1742_v63 = vadd.f32 %v1947_v55, %v1741_v62 }
 0x67e   : > { %1754 = vst [vmem:[%s464_s24 + $0x8] sm:$0xff] %v1742_v63 }
 0x67f   : > { %2603 = shalt.err (!%p2600_p11)
}
 0x680   : > { %s2604_s14 = scalar_lea.hbm %s3164_s16, 512  ;;  %s2608_s26 = scalar_lea.hbm %s3218_s11, 1024 }
 0x681   : > { %p2605_p9 = scmp.ne.s32.totalorder %s3164_s16, %s2604_s14  ;;  %p2609_p12 = scmp.lt.s32.totalorder %s3164_s16, %s3218_s11 }
 0x682   : > { %p2610_p10 = scmp.lt.s32.totalorder %s2608_s26, %s2604_s14 }
 0x683   : > { %p2606_p0 = pnand %p2605_p9, %p2784_p5 }
 0x684   : > { %p2611_p1 = por %p2610_p10, %p2609_p12 }
 0x685   : > { %p2607_p3 = pneg %p2606_p0 }
 0x687   : > { %p2612_p2 = pnand %p2611_p1, %p2607_p3 }
 0x689   : > { %2615 = shalt.err (!%p2612_p2)
}
 0x68a   : > { %s2685_s15 = smov 128  }
 0x68b   : > { %2250 = dma.vmem_to_hbm [thread:$0]  (%p2784_p5), %s3159_s30, 512, %s3164_s16, %s3166_s19, %s2685_s15, %s2685_s15, %s2681_s25  }
 0x68c PF: > { %p2282_p6 = scmp.ge.s32.totalorder %s2662_s20, 2  ;;  %s1786_s21 = sand.u32 1, %s2650_s17  }
 0x68d   : > { %p3239_p4 = scmp.ne.s32.totalorder %s3228_s28, 0  ;;  %s1787_s23 = scalar_lea.sflag [#allocation5], %s1786_s21 }
 0x68f   : > { %p2269_p7 = pnand %p2282_p6, %p3239_p4 }
 0x691   : > { %p2270_p8 = pneg %p2269_p7 }
 0x693   : > { %2645 = dma.done.wait (%p2270_p8), %s1787_s23, 512  }
 0x694   : > { %2647 = vsyncadd (%p2270_p8), %s1787_s23, 4294966784  ;;  %s3240_s20 = sld [smem:[#allocation18_spill]]  ;;  %s3243_s17 = smov %s2654_s18 }
 0x695   : > { %s3241_s27 = sld [smem:[#allocation17_spill]] }
 0x696   : > { %s3242_s19 = sld [smem:[#allocation19_spill]] }
 0x69a   : > { %p24_p13 = scmp.ge.s32.totalorder %s3240_s20, 4  }
 0x69b   : > { %s3244_s18 = smov %s3241_s27 }
 0x69c   :  { %26 = sbr.rel (!%p24_p13) target bundleno = 6 (0x6), region = 123 }
 0x6a1   :  { %1792 = vsyncpa [#allocation4], 1 }
 0x6a2   :  { %1794 = vsyncpa [#allocation4 + $0x1], 1 }
 0x6a3   :  { %1795 = vsyncpa [#allocation7], 1 }
 0x6a4   :  { %1796 = vsyncpa [#allocation10], 1 }
 0x6a5   :  { %1797 = vsyncpa [#allocation5], 1 }
 0x6a6   :  { %1799 = vsyncpa [#allocation5 + $0x1], 1 }

</bundles_post_ra>
